<compile_context>
chip_gen: v5e
topology: v5e:2x2
jax: 0.10.0
libtpu: 0.0.40
codegen_flags: <defaults>
</compile_context>

<pallas_src>
import jax
import jax.numpy as jnp
from jax.experimental import pallas as pl
from jax.experimental.pallas import tpu as pltpu


def _round_up(x, m):
    return (x + m - 1) // m * m


# ----------------------------------------------------------------------------
# Kernel
# ----------------------------------------------------------------------------
def _encoder_kernel(x_ref, eps_ref,
                    w1_ref, b1_ref, w2_ref, b2_ref, w3_ref, b3_ref,
                    wh_ref, bh_ref,
                    out_ref):
    """One batch tile: 3x (matmul + bias + ReLU), fused loc|log-scale head,
    reparameterized sample.  out_ref is a single lane-dense slab
    [ z | loc | scale | log_scale ], each cp (multiple of 128) lanes wide,
    so every store is a full, unmasked 128-lane-aligned store."""
    cp = eps_ref.shape[-1]

    # In-kernel f32 -> bf16 cast of the input tile (VPU filler under the MXU);
    # avoids materializing a separate bf16/padded copy of x in HBM.
    x = x_ref[...].astype(jnp.bfloat16)

    h = jnp.dot(x, w1_ref[...], preferred_element_type=jnp.float32)
    h = jnp.maximum(h + b1_ref[...], 0.0).astype(jnp.bfloat16)
    h = jnp.dot(h, w2_ref[...], preferred_element_type=jnp.float32)
    h = jnp.maximum(h + b2_ref[...], 0.0).astype(jnp.bfloat16)
    h = jnp.dot(h, w3_ref[...], preferred_element_type=jnp.float32)
    h = jnp.maximum(h + b3_ref[...], 0.0).astype(jnp.bfloat16)

    # Fused heads: columns [0:cp] -> loc, [cp:2cp] -> log-scale.
    head = jnp.dot(h, wh_ref[...], preferred_element_type=jnp.float32) + bh_ref[...]
    loc = head[:, :cp]
    log_scale = head[:, cp:]
    # TODO(synk): torch.exp is unclamped; kept faithful (may overflow to inf).
    scale = jnp.exp(log_scale)
    z = loc + scale * eps_ref[...]          # reparameterized sample

    out_ref[:, 0 * cp:1 * cp] = z
    out_ref[:, 1 * cp:2 * cp] = loc
    out_ref[:, 2 * cp:3 * cp] = scale
    out_ref[:, 3 * cp:4 * cp] = log_scale


# ----------------------------------------------------------------------------
# Wrapper helpers
# ----------------------------------------------------------------------------
def _resident_spec(shape):
    """Constant block index -> block stays resident in VMEM across the grid.
    Single-buffered: double-buffering a never-changing block only wastes VMEM."""
    try:
        return pl.BlockSpec(shape, lambda i: (0, 0), pipeline_mode=pl.Buffered(1))
    except TypeError:  # older jax without pipeline_mode: fall back to default
        return pl.BlockSpec(shape, lambda i: (0, 0))


def _choose_batch_tile(B):
    # >= 2 grid steps whenever B > 16 (v7x megacore), tiles are multiples of 16
    # (bf16 sublane packing), capped at 512 rows to amortize per-step overhead.
    # TODO(synk): sweep the 512 cap in {256, 512, 1024} per platform.
    return max(16, min(512, _round_up(-(-B // 2), 16)))


def _vmem_limit_bytes(tb, f_pad, h1, h2, h3, cp):
    w = 2 * (f_pad * h1 + h1 * h2 + h2 * h3 + h3 * 2 * cp)   # bf16, 1-buffered
    bias = 4 * (h1 + h2 + h3 + 2 * cp)                        # f32
    x_t = 2 * tb * f_pad * 4                                  # f32, 2-buffered
    eps_t = 2 * tb * cp * 4
    out_t = 2 * tb * 4 * cp * 4
    interm = tb * (h1 + h2 + h3 + 4 * cp) * 6                 # f32 + bf16 copies
    total = int(1.5 * (w + bias + x_t + eps_t + out_t + interm)) + (2 << 20)
    return max(min(total, 64 << 20), 32 << 20)


# ----------------------------------------------------------------------------
# Forward
# ----------------------------------------------------------------------------
def encoder_dense_vae_forward(x, eps, kparams):
    """x: (B, H, W) or (B, F) float32; eps: (B, code_dims) float32 ~ N(0, std).

    Returns (z, loc, scale, log_scale), each (B, code_dims) float32.
    (z, loc, scale) mirror the torch module's return; log_scale is an extra
    output so the KL term can reuse it without recomputing log(scale).
    """
    B = x.shape[0]
    x_flat = x.reshape(B, -1)                    # torch.flatten(x, start_dim=1)
    F = x_flat.shape[1]
    code_dims = eps.shape[1]

    f_pad = kparams["w1"].shape[0]
    h1 = kparams["w2"].shape[0]
    h2 = kparams["w3"].shape[0]
    h3 = kparams["wh"].shape[0]
    cp = kparams["bh"].shape[1] // 2

    tb = _choose_batch_tile(B)
    b_pad = _round_up(B, tb)

    # x stays f32 (cast to bf16 in-kernel).  Fast path: hand the flattened
    # input to pallas_call directly -> no extra padded HBM copy at all.
    if F == f_pad and b_pad == B:
        x_in = x_flat.astype(jnp.float32)
    else:
        x_in = jnp.pad(x_flat.astype(jnp.float32),
                       ((0, b_pad - B), (0, f_pad - F)))
    eps_in = jnp.pad(eps.astype(jnp.float32),
                     ((0, b_pad - B), (0, cp - code_dims)))

    args = (x_in, eps_in,
            kparams["w1"], kparams["b1"],
            kparams["w2"], kparams["b2"],
            kparams["w3"], kparams["b3"],
            kparams["wh"], kparams["bh"])

    # TODO(synk): for image-scale in_features (w1 more than a few MiB), add a K
    # grid axis over f_pad for layer 1 with an f32 accumulator scratch
    # (pl.when init/finalize) — needed to fit v7x's 64 MiB VMEM.
    in_specs = [pl.BlockSpec((tb, f_pad), lambda i: (i, 0)),
                pl.BlockSpec((tb, cp), lambda i: (i, 0))]
    in_specs += [_resident_spec(a.shape) for a in args[2:]]

    out = pl.pallas_call(
        _encoder_kernel,
        out_shape=jax.ShapeDtypeStruct((b_pad, 4 * cp), jnp.float32),
        grid=(b_pad // tb,),
        in_specs=in_specs,
        out_specs=pl.BlockSpec((tb, 4 * cp), lambda i: (i, 0)),
        compiler_params=pltpu.CompilerParams(
            dimension_semantics=("parallel",),
            vmem_limit_bytes=_vmem_limit_bytes(tb, f_pad, h1, h2, h3, cp)),
    )(*args)

    z = out[:B, 0 * cp:0 * cp + code_dims]
    loc = out[:B, 1 * cp:1 * cp + code_dims]
    scale = out[:B, 2 * cp:2 * cp + code_dims]
    log_scale = out[:B, 3 * cp:3 * cp + code_dims]
    return z, loc, scale, log_scale


# ----------------------------------------------------------------------------
# Parameters
# ----------------------------------------------------------------------------
def init_params(key, in_features, code_dims):
    """nn.Linear-style U(-1/sqrt(fan_in), 1/sqrt(fan_in)) init.
    Weights stored transposed (fan_in, fan_out); biases as (1, fan_out)."""
    dims = [(in_features, 400), (400, 200), (200, 100),
            (100, code_dims), (100, code_dims)]
    params = {}
    for i, (fin, fout) in enumerate(dims, start=1):
        key, kw, kb = jax.random.split(key, 3)
        bound = 1.0 / (fin ** 0.5)
        params[f"w{i}"] = jax.random.uniform(
            kw, (fin, fout), jnp.float32, minval=-bound, maxval=bound)
        params[f"b{i}"] = jax.random.uniform(
            kb, (1, fout), jnp.float32, minval=-bound, maxval=bound)
    return params


def prepare_kernel_params(params, in_features, code_dims):
    """Pad once at init: 128-aligned dims, fused loc|log-scale head, bf16 weights."""
    f_pad = _round_up(in_features, 128)
    h1 = _round_up(params["w1"].shape[1], 128)   # 400 -> 512
    h2 = _round_up(params["w2"].shape[1], 128)   # 200 -> 256
    h3 = _round_up(params["w3"].shape[1], 128)   # 100 -> 128
    cp = _round_up(code_dims, 128)               # 32  -> 128

    def pad2(a, shape):
        return jnp.pad(a, [(0, s - d) for d, s in zip(a.shape, shape)])

    kp = {
        "w1": pad2(params["w1"], (f_pad, h1)).astype(jnp.bfloat16),
        "b1": pad2(params["b1"], (1, h1)),
        "w2": pad2(params["w2"], (h1, h2)).astype(jnp.bfloat16),
        "b2": pad2(params["b2"], (1, h2)),
        "w3": pad2(params["w3"], (h2, h3)).astype(jnp.bfloat16),
        "b3": pad2(params["b3"], (1, h3)),
    }
    # Fused head weight (h3, 2*cp): [:, 0:cp] -> loc, [:, cp:2cp] -> log-scale.
    fin4 = params["w4"].shape[0]
    wh = jnp.zeros((h3, 2 * cp), jnp.float32)
    wh = wh.at[:fin4, :code_dims].set(params["w4"])
    wh = wh.at[:fin4, cp:cp + code_dims].set(params["w5"])
    bh = jnp.zeros((1, 2 * cp), jnp.float32)
    bh = bh.at[:, :code_dims].set(params["b4"])
    bh = bh.at[:, cp:cp + code_dims].set(params["b5"])
    kp["wh"] = wh.astype(jnp.bfloat16)
    kp["bh"] = bh
    return kp


# ----------------------------------------------------------------------------
# Pure-JAX reference (same bf16-matmul / f32-accumulate numerics as the kernel)
# ----------------------------------------------------------------------------
def _ref_forward(x_flat, eps, params):
    def lin(h, w, b):
        return jnp.dot(h.astype(jnp.bfloat16), w.astype(jnp.bfloat16),
                       preferred_element_type=jnp.float32) + b
    h = jnp.maximum(lin(x_flat, params["w1"], params["b1"]), 0.0)
    h = jnp.maximum(lin(h, params["w2"], params["b2"]), 0.0)
    h = jnp.maximum(lin(h, params["w3"], params["b3"]), 0.0)
    loc = lin(h, params["w4"], params["b4"])
    log_scale = lin(h, params["w5"], params["b5"])
    scale = jnp.exp(log_scale)
    return loc + scale * eps, loc, scale, log_scale


if __name__ == "__main__":
    # Small shapes consistent with the module: x is (B, H, W) -> flatten to (B, H*W).
    B, H, W = 8, 16, 16
    code_dims = 32
    std_scale = 1.0

    key = jax.random.PRNGKey(0)
    k_x, k_eps, k_p = jax.random.split(key, 3)

    x = jax.random.normal(k_x, (B, H, W), jnp.float32)
    # eps ~ Normal(0, std_scale), sampled outside the kernel (reparameterization).
    eps = jax.random.normal(k_eps, (B, code_dims), jnp.float32) * std_scale

    params = init_params(k_p, H * W, code_dims)
    kparams = prepare_kernel_params(params, H * W, code_dims)

    fwd = jax.jit(encoder_dense_vae_forward)
    z, loc, scale, log_scale = fwd(x, eps, kparams)
    jax.block_until_ready((z, loc, scale, log_scale))

    # PyTorch side-effect attribute (self.kl_loss), mirrored verbatim
    # (non-standard formula, but that is what the module computes); uses the
    # kernel's log_scale output instead of re-taking log(scale).
    kl = 0.5 * ((scale / std_scale) ** 2 + loc ** 2
                - (log_scale - jnp.log(std_scale)) + code_dims).sum(axis=1).mean()
    jax.block_until_ready(kl)

    # Correctness vs a pure-JAX reference with identical bf16/f32 numerics.
    x_flat = x.reshape(B, H * W)
    z_r, loc_r, scale_r, log_scale_r = _ref_forward(x_flat, eps, params)
    assert jnp.allclose(loc, loc_r, atol=2e-3, rtol=2e-3)
    assert jnp.allclose(log_scale, log_scale_r, atol=2e-3, rtol=2e-3)
    assert jnp.allclose(scale, scale_r, atol=2e-3, rtol=2e-3)
    assert jnp.allclose(z, z_r, atol=2e-3, rtol=2e-3)

    print("KERNEL_OK")
</pallas_src>

<mosaic_0001>
module attributes {stable_mosaic.version = 11 : i64} {
  func.func @_encoder_kernel(%arg0: i32, %arg1: memref<16x256xf32, #tpu.memory_space<vmem>>, %arg2: memref<16x128xf32, #tpu.memory_space<vmem>>, %arg3: memref<256x512xbf16, #tpu.memory_space<vmem>>, %arg4: memref<1x512xf32, #tpu.memory_space<vmem>>, %arg5: memref<512x256xbf16, #tpu.memory_space<vmem>>, %arg6: memref<1x256xf32, #tpu.memory_space<vmem>>, %arg7: memref<256x128xbf16, #tpu.memory_space<vmem>>, %arg8: memref<1x128xf32, #tpu.memory_space<vmem>>, %arg9: memref<128x256xbf16, #tpu.memory_space<vmem>>, %arg10: memref<1x256xf32, #tpu.memory_space<vmem>>, %arg11: memref<16x512xf32, #tpu.memory_space<vmem>>) attributes {dimension_semantics = [#tpu.dimension_semantics<parallel>], iteration_bounds = array<i64: 1>, scalar_prefetch = 0 : i64, scratch_operands = 0 : i64, tpu.core_type = #tpu.core_type<tc>, window_params = [{transform_indices = @transform_0, window_bounds = array<i64: 16, 256>}, {transform_indices = @transform_1, window_bounds = array<i64: 16, 128>}, {pipeline_mode = #tpu.pipeline_mode<synchronous>, transform_indices = @transform_2, window_bounds = array<i64: 256, 512>}, {pipeline_mode = #tpu.pipeline_mode<synchronous>, transform_indices = @transform_3, window_bounds = array<i64: 1, 512>}, {pipeline_mode = #tpu.pipeline_mode<synchronous>, transform_indices = @transform_4, window_bounds = array<i64: 512, 256>}, {pipeline_mode = #tpu.pipeline_mode<synchronous>, transform_indices = @transform_5, window_bounds = array<i64: 1, 256>}, {pipeline_mode = #tpu.pipeline_mode<synchronous>, transform_indices = @transform_6, window_bounds = array<i64: 256, 128>}, {pipeline_mode = #tpu.pipeline_mode<synchronous>, transform_indices = @transform_7, window_bounds = array<i64: 1, 128>}, {pipeline_mode = #tpu.pipeline_mode<synchronous>, transform_indices = @transform_8, window_bounds = array<i64: 128, 256>}, {pipeline_mode = #tpu.pipeline_mode<synchronous>, transform_indices = @transform_9, window_bounds = array<i64: 1, 256>}, {transform_indices = @transform_10, window_bounds = array<i64: 16, 512>}]} {
    %c0 = arith.constant 0 : index
    %c0_0 = arith.constant 0 : index
    %0 = vector.load %arg1[%c0, %c0_0] : memref<16x256xf32, #tpu.memory_space<vmem>>, vector<16x256xf32>
    %1 = arith.truncf %0 : vector<16x256xf32> to vector<16x256xbf16>
    %c0_1 = arith.constant 0 : index
    %c0_2 = arith.constant 0 : index
    %2 = vector.load %arg3[%c0_1, %c0_2] : memref<256x512xbf16, #tpu.memory_space<vmem>>, vector<256x512xbf16>
    %cst = arith.constant dense<0.000000e+00> : vector<16x512xf32>
    %3 = tpu.matmul %1, %2, %cst {dimension_numbers = #tpu.dot_dimension_numbers<[1], [0], [0], [1], [0, 0, 1, 1], [], []>} : vector<16x256xbf16>, vector<256x512xbf16>, vector<16x512xf32> -> vector<16x512xf32>
    %c0_3 = arith.constant 0 : index
    %c0_4 = arith.constant 0 : index
    %4 = vector.load %arg4[%c0_3, %c0_4] : memref<1x512xf32, #tpu.memory_space<vmem>>, vector<1x512xf32>
    %5 = vector.broadcast %4 : vector<1x512xf32> to vector<16x512xf32>
    %6 = arith.addf %3, %5 : vector<16x512xf32>
    %cst_5 = arith.constant 0.000000e+00 : f32
    %7 = vector.broadcast %cst_5 : f32 to vector<16x512xf32>
    %8 = arith.maximumf %6, %7 : vector<16x512xf32>
    %9 = arith.truncf %8 : vector<16x512xf32> to vector<16x512xbf16>
    %c0_6 = arith.constant 0 : index
    %c0_7 = arith.constant 0 : index
    %10 = vector.load %arg5[%c0_6, %c0_7] : memref<512x256xbf16, #tpu.memory_space<vmem>>, vector<512x256xbf16>
    %cst_8 = arith.constant dense<0.000000e+00> : vector<16x256xf32>
    %11 = tpu.matmul %9, %10, %cst_8 {dimension_numbers = #tpu.dot_dimension_numbers<[1], [0], [0], [1], [0, 0, 1, 1], [], []>} : vector<16x512xbf16>, vector<512x256xbf16>, vector<16x256xf32> -> vector<16x256xf32>
    %c0_9 = arith.constant 0 : index
    %c0_10 = arith.constant 0 : index
    %12 = vector.load %arg6[%c0_9, %c0_10] : memref<1x256xf32, #tpu.memory_space<vmem>>, vector<1x256xf32>
    %13 = vector.broadcast %12 : vector<1x256xf32> to vector<16x256xf32>
    %14 = arith.addf %11, %13 : vector<16x256xf32>
    %cst_11 = arith.constant 0.000000e+00 : f32
    %15 = vector.broadcast %cst_11 : f32 to vector<16x256xf32>
    %16 = arith.maximumf %14, %15 : vector<16x256xf32>
    %17 = arith.truncf %16 : vector<16x256xf32> to vector<16x256xbf16>
    %c0_12 = arith.constant 0 : index
    %c0_13 = arith.constant 0 : index
    %18 = vector.load %arg7[%c0_12, %c0_13] : memref<256x128xbf16, #tpu.memory_space<vmem>>, vector<256x128xbf16>
    %cst_14 = arith.constant dense<0.000000e+00> : vector<16x128xf32>
    %19 = tpu.matmul %17, %18, %cst_14 {dimension_numbers = #tpu.dot_dimension_numbers<[1], [0], [0], [1], [0, 0, 1, 1], [], []>} : vector<16x256xbf16>, vector<256x128xbf16>, vector<16x128xf32> -> vector<16x128xf32>
    %c0_15 = arith.constant 0 : index
    %c0_16 = arith.constant 0 : index
    %20 = vector.load %arg8[%c0_15, %c0_16] : memref<1x128xf32, #tpu.memory_space<vmem>>, vector<1x128xf32>
    %21 = vector.broadcast %20 : vector<1x128xf32> to vector<16x128xf32>
    %22 = arith.addf %19, %21 : vector<16x128xf32>
    %cst_17 = arith.constant 0.000000e+00 : f32
    %23 = vector.broadcast %cst_17 : f32 to vector<16x128xf32>
    %24 = arith.maximumf %22, %23 : vector<16x128xf32>
    %25 = arith.truncf %24 : vector<16x128xf32> to vector<16x128xbf16>
    %c0_18 = arith.constant 0 : index
    %c0_19 = arith.constant 0 : index
    %26 = vector.load %arg9[%c0_18, %c0_19] : memref<128x256xbf16, #tpu.memory_space<vmem>>, vector<128x256xbf16>
    %cst_20 = arith.constant dense<0.000000e+00> : vector<16x256xf32>
    %27 = tpu.matmul %25, %26, %cst_20 {dimension_numbers = #tpu.dot_dimension_numbers<[1], [0], [0], [1], [0, 0, 1, 1], [], []>} : vector<16x128xbf16>, vector<128x256xbf16>, vector<16x256xf32> -> vector<16x256xf32>
    %c0_21 = arith.constant 0 : index
    %c0_22 = arith.constant 0 : index
    %28 = vector.load %arg10[%c0_21, %c0_22] : memref<1x256xf32, #tpu.memory_space<vmem>>, vector<1x256xf32>
    %29 = vector.broadcast %28 : vector<1x256xf32> to vector<16x256xf32>
    %30 = arith.addf %27, %29 : vector<16x256xf32>
    %31 = vector.extract_strided_slice %30 {offsets = [0, 0], sizes = [16, 128], strides = [1, 1]} : vector<16x256xf32> to vector<16x128xf32>
    %32 = vector.extract_strided_slice %30 {offsets = [0, 128], sizes = [16, 128], strides = [1, 1]} : vector<16x256xf32> to vector<16x128xf32>
    %33 = math.exp %32 : vector<16x128xf32>
    %c0_23 = arith.constant 0 : index
    %c0_24 = arith.constant 0 : index
    %34 = vector.load %arg2[%c0_23, %c0_24] : memref<16x128xf32, #tpu.memory_space<vmem>>, vector<16x128xf32>
    %35 = arith.mulf %33, %34 : vector<16x128xf32>
    %36 = arith.addf %31, %35 : vector<16x128xf32>
    %c0_25 = arith.constant 0 : index
    %c0_26 = arith.constant 0 : index
    %37 = vector.load %arg11[%c0_25, %c0_26] : memref<16x512xf32, #tpu.memory_space<vmem>>, vector<16x128xf32>
    tpu.vector_store %arg11[%c0_25, %c0_26], %36 {strides = array<i32>} : memref<16x512xf32, #tpu.memory_space<vmem>>, vector<16x128xf32>,
    %c0_27 = arith.constant 0 : index
    %c128 = arith.constant 128 : index
    %38 = vector.load %arg11[%c0_27, %c128] : memref<16x512xf32, #tpu.memory_space<vmem>>, vector<16x128xf32>
    tpu.vector_store %arg11[%c0_27, %c128], %31 {strides = array<i32>} : memref<16x512xf32, #tpu.memory_space<vmem>>, vector<16x128xf32>,
    %c0_28 = arith.constant 0 : index
    %c256 = arith.constant 256 : index
    %39 = vector.load %arg11[%c0_28, %c256] : memref<16x512xf32, #tpu.memory_space<vmem>>, vector<16x128xf32>
    tpu.vector_store %arg11[%c0_28, %c256], %33 {strides = array<i32>} : memref<16x512xf32, #tpu.memory_space<vmem>>, vector<16x128xf32>,
    %c0_29 = arith.constant 0 : index
    %c384 = arith.constant 384 : index
    %40 = vector.load %arg11[%c0_29, %c384] : memref<16x512xf32, #tpu.memory_space<vmem>>, vector<16x128xf32>
    tpu.vector_store %arg11[%c0_29, %c384], %32 {strides = array<i32>} : memref<16x512xf32, #tpu.memory_space<vmem>>, vector<16x128xf32>,
    return
  }
  func.func @transform_0(%arg0: i32) -> (i32, i32) {
    %c0_i32 = arith.constant 0 : i32
    %c0_i32_0 = arith.constant 0 : i32
    return %arg0, %c0_i32 : i32, i32
  }
  func.func @transform_1(%arg0: i32) -> (i32, i32) {
    %c0_i32 = arith.constant 0 : i32
    %c0_i32_0 = arith.constant 0 : i32
    return %arg0, %c0_i32 : i32, i32
  }
  func.func @transform_2(%arg0: i32) -> (i32, i32) {
    %c0_i32 = arith.constant 0 : i32
    %c0_i32_0 = arith.constant 0 : i32
    %c0_i32_1 = arith.constant 0 : i32
    return %c0_i32, %c0_i32_0 : i32, i32
  }
  func.func @transform_3(%arg0: i32) -> (i32, i32) {
    %c0_i32 = arith.constant 0 : i32
    %c0_i32_0 = arith.constant 0 : i32
    %c0_i32_1 = arith.constant 0 : i32
    return %c0_i32, %c0_i32_0 : i32, i32
  }
  func.func @transform_4(%arg0: i32) -> (i32, i32) {
    %c0_i32 = arith.constant 0 : i32
    %c0_i32_0 = arith.constant 0 : i32
    %c0_i32_1 = arith.constant 0 : i32
    return %c0_i32, %c0_i32_0 : i32, i32
  }
  func.func @transform_5(%arg0: i32) -> (i32, i32) {
    %c0_i32 = arith.constant 0 : i32
    %c0_i32_0 = arith.constant 0 : i32
    %c0_i32_1 = arith.constant 0 : i32
    return %c0_i32, %c0_i32_0 : i32, i32
  }
  func.func @transform_6(%arg0: i32) -> (i32, i32) {
    %c0_i32 = arith.constant 0 : i32
    %c0_i32_0 = arith.constant 0 : i32
    %c0_i32_1 = arith.constant 0 : i32
    return %c0_i32, %c0_i32_0 : i32, i32
  }
  func.func @transform_7(%arg0: i32) -> (i32, i32) {
    %c0_i32 = arith.constant 0 : i32
    %c0_i32_0 = arith.constant 0 : i32
    %c0_i32_1 = arith.constant 0 : i32
    return %c0_i32, %c0_i32_0 : i32, i32
  }
  func.func @transform_8(%arg0: i32) -> (i32, i32) {
    %c0_i32 = arith.constant 0 : i32
    %c0_i32_0 = arith.constant 0 : i32
    %c0_i32_1 = arith.constant 0 : i32
    return %c0_i32, %c0_i32_0 : i32, i32
  }
  func.func @transform_9(%arg0: i32) -> (i32, i32) {
    %c0_i32 = arith.constant 0 : i32
    %c0_i32_0 = arith.constant 0 : i32
    %c0_i32_1 = arith.constant 0 : i32
    return %c0_i32, %c0_i32_0 : i32, i32
  }
  func.func @transform_10(%arg0: i32) -> (i32, i32) {
    %c0_i32 = arith.constant 0 : i32
    %c0_i32_0 = arith.constant 0 : i32
    return %arg0, %c0_i32 : i32, i32
  }
}

</mosaic_0001>

<bundles_post_ra>
// kernel: encoder_dense_vae_forward.1
= control target key start
LH: loop header
LB: loop body
LE: loop exit
PB: predicated region body
PF: predicated region fallthrough
CT: control target
= control target key end

     0   :  { %15 = vsyncpa [#allocation3], 0  ;;  %s2510_s0 = inlined_call_operand.vmem [shape: f32[16,256], index: 0, kind: input, shape index: {}]   ;;  %s2511_s1 = inlined_call_operand.vmem [shape: f32[16,128], index: 1, kind: input, shape index: {}]   ;;  %s2512_s2 = inlined_call_operand.hbm [shape: bf16[256,512], index: 2, kind: input, shape index: {}]   ;;  %s2513_s3 = inlined_call_operand.vmem [shape: f32[1,512], index: 3, kind: input, shape index: {}]   ;;  %s2514_s4 = inlined_call_operand.hbm [shape: bf16[512,256], index: 4, kind: input, shape index: {}]   ;;  %s2515_s5 = inlined_call_operand.vmem [shape: f32[1,256], index: 5, kind: input, shape index: {}]   ;;  %s2516_s6 = inlined_call_operand.vmem [shape: bf16[256,128], index: 6, kind: input, shape index: {}]   ;;  %s2517_s7 = inlined_call_operand.vmem [shape: f32[1,128], index: 7, kind: input, shape index: {}]   ;;  %s2518_s8 = inlined_call_operand.hbm [shape: bf16[128,256], index: 8, kind: input, shape index: {}]   ;;  %s2519_s9 = inlined_call_operand.vmem [shape: f32[1,256], index: 9, kind: input, shape index: {}]   ;;  %s2520_s10 = inlined_call_operand.vmem [shape: f32[16,512], index: 10, kind: output, shape index: {}]  }
   0x1   :  { %16 = vsyncpa [#allocation5], 0  ;;  %s40_s15 = sshll.u32 %s2514_s4, 4  ;;  %s2319_s16 = smov [#allocation4]   ;;  %s41_s15 = int_to_ptr.hbm [resolvable:$true] %s40_s15 }
   0x2   :  { %s42_s17 = sshll.u32 %s2319_s16, 4  ;;  %s25_s20 = sshll.u32 %s2512_s2, 4  ;;  %s43_s17 = int_to_ptr.vmem [resolvable:$true] %s42_s17  ;;  %s26_s20 = int_to_ptr.hbm [resolvable:$true] %s25_s20 }
   0x3   :  { %s2320_s21 = smov 128   ;;  %s2321_s22 = smov 8  }
   0x4   :  { %48 = dma.hbm_to_vmem [thread:$0]  %s41_s15, 8192, %s43_s17, [#allocation5], %s2320_s21, %s2320_s21, %s2321_s22  }
   0x5   :  { %s2322_s23 = smov [#allocation2]   ;;  %s2323_s25 = smov 256  }
   0x6   :  { %s27_s24 = sshll.u32 %s2322_s23, 4  ;;  %s2324_s26 = smov 16   ;;  %s28_s24 = int_to_ptr.vmem [resolvable:$true] %s27_s24 }
   0x7   :  { %33 = dma.hbm_to_vmem [thread:$0]  %s26_s20, 8192, %s28_s24, [#allocation3], %s2323_s25, %s2323_s25, %s2324_s26  }
   0x8   :  { %s59_s28 = sshll.u32 %s2518_s8, 4  ;;  %s2325_s29 = smov [#allocation6]   ;;  %s60_s28 = int_to_ptr.hbm [resolvable:$true] %s59_s28 }
   0x9   :  { %s61_s30 = sshll.u32 %s2325_s29, 4  ;;  %s62_s30 = int_to_ptr.vmem [resolvable:$true] %s61_s30 }
   0xa   :  { %67 = dma.hbm_to_vmem [thread:$0]  %s60_s28, 2048, %s62_s30, [#allocation5], %s2320_s21, %s2320_s21, %s2321_s22  }
   0xb   :  { %2315 = dma.done.wait [#allocation3], 8192  }
   0xc   :  { %2316 = vsyncadd [#allocation3], 4294959104 }
   0xd   :  { %2317 = dma.done.wait [#allocation5], 10240  }
   0xe   :  { %2318 = vsyncadd [#allocation5], 4294957056  ;;  %v1545_v0 = vld [vmem:[#allocation2 + $0xe0] sm:$0xf]  ;;  %v2101_v1 = vld [vmem:[#allocation2 + $0xec] sm:$0xf0] }
   0xf   :  { %v1673_v2 = vld [vmem:[#allocation2 + $0x1e0] sm:$0xf]  ;;  %v1546_v3 = vor.u32 %v2101_v1, %v1545_v0  ;;  %v2133_v4 = vld [vmem:[#allocation2 + $0x1ec] sm:$0xf0]  ;;  %v2099_v5 = vld [vmem:[#allocation2 + $0xe4] sm:$0xf] }
  0x10   :  { %v1547_v6 = vld [vmem:[#allocation2 + $0xf0] sm:$0xf0]  ;;  %v1674_v7 = vor.u32 %v2133_v4, %v1673_v2  ;;  %v2131_v9 = vld [vmem:[#allocation2 + $0x1e4] sm:$0xf]  ;;  %v1529_v11 = vld [vmem:[#allocation2 + $0xc0] sm:$0xf] }
  0x11   :  { %v1550_v8 = vor.u32 %v2099_v5, %v1547_v6  ;;  %v1675_v10 = vld [vmem:[#allocation2 + $0x1f0] sm:$0xf0]  ;;  %482 = vmatpush.bf16.msra.mxu0 %v1546_v3  ;;  %v2097_v13 = vld [vmem:[#allocation2 + $0xcc] sm:$0xf0]  ;;  %v1657_v14 = vld [vmem:[#allocation2 + $0x1c0] sm:$0xf] }
  0x12   :  { %v1678_v12 = vor.u32 %v2131_v9, %v1675_v10  ;;  %v2129_v15 = vld [vmem:[#allocation2 + $0x1cc] sm:$0xf0]  ;;  %496 = vmatpush.bf16.msra.mxu1 %v1674_v7  ;;  %v1530_v16 = vor.u32 %v2097_v13, %v1529_v11  ;;  %v2095_v18 = vld [vmem:[#allocation2 + $0xc4] sm:$0xf]  ;;  %v1531_v19 = vld [vmem:[#allocation2 + $0xd0] sm:$0xf0] }
  0x13   :  { %510 = vmatpush.bf16.msra.mxu2 %v1550_v8  ;;  %v1658_v17 = vor.u32 %v2129_v15, %v1657_v14  ;;  %v2127_v20 = vld [vmem:[#allocation2 + $0x1c4] sm:$0xf]  ;;  %v1534_v21 = vor.u32 %v2095_v18, %v1531_v19  ;;  %v1659_v22 = vld [vmem:[#allocation2 + $0x1d0] sm:$0xf0]  ;;  %v1513_v23 = vld [vmem:[#allocation2 + $0xa0] sm:$0xf] }
  0x14   :  { %524 = vmatpush.bf16.msra.mxu3 %v1678_v12  ;;  %v2093_v24 = vld [vmem:[#allocation2 + $0xac] sm:$0xf0]  ;;  %v1662_v25 = vor.u32 %v2127_v20, %v1659_v22  ;;  %v1641_v26 = vld [vmem:[#allocation2 + $0x1a0] sm:$0xf]  ;;  %v2091_v28 = vld [vmem:[#allocation2 + $0xa4] sm:$0xf] }
  0x15   :  { %v2125_v27 = vld [vmem:[#allocation2 + $0x1ac] sm:$0xf0]  ;;  %483 = vmatpush.bf16.msra.mxu0 %v1530_v16  ;;  %v1514_v29 = vor.u32 %v2093_v24, %v1513_v23  ;;  %v1515_v30 = vld [vmem:[#allocation2 + $0xb0] sm:$0xf0]  ;;  %v2123_v31 = vld [vmem:[#allocation2 + $0x1a4] sm:$0xf] }
  0x16   :  { %v1643_v32 = vld [vmem:[#allocation2 + $0x1b0] sm:$0xf0]  ;;  %497 = vmatpush.bf16.msra.mxu1 %v1658_v17  ;;  %v1642_v33 = vor.u32 %v2125_v27, %v1641_v26  ;;  %v1518_v34 = vor.u32 %v2091_v28, %v1515_v30  ;;  %v1497_v35 = vld [vmem:[#allocation2 + $0x80] sm:$0xf]  ;;  %v2089_v36 = vld [vmem:[#allocation2 + $0x8c] sm:$0xf0] }
  0x17   :  { %511 = vmatpush.bf16.msra.mxu2 %v1534_v21  ;;  %v1625_v37 = vld [vmem:[#allocation2 + $0x180] sm:$0xf]  ;;  %v1646_v38 = vor.u32 %v2123_v31, %v1643_v32  ;;  %v2121_v39 = vld [vmem:[#allocation2 + $0x18c] sm:$0xf0]  ;;  %v2087_v40 = vld [vmem:[#allocation2 + $0x84] sm:$0xf]  ;;  %v1498_v44 = vor.u32 %v2089_v36, %v1497_v35 }
  0x18   :  { %525 = vmatpush.bf16.msra.mxu3 %v1662_v25  ;;  %v1499_v41 = vld [vmem:[#allocation2 + $0x90] sm:$0xf0]  ;;  %v2119_v42 = vld [vmem:[#allocation2 + $0x184] sm:$0xf]  ;;  %v1626_v45 = vor.u32 %v2121_v39, %v1625_v37  ;;  %v1481_v47 = vld [vmem:[#allocation2 + $0x60] sm:$0xf] }
  0x19   :  { %v1627_v43 = vld [vmem:[#allocation2 + $0x190] sm:$0xf0]  ;;  %484 = vmatpush.bf16.msra.mxu0 %v1514_v29  ;;  %v1502_v46 = vor.u32 %v2087_v40, %v1499_v41  ;;  %v2085_v48 = vld [vmem:[#allocation2 + $0x6c] sm:$0xf0]  ;;  %v1609_v49 = vld [vmem:[#allocation2 + $0x160] sm:$0xf] }
  0x1a   :  { %498 = vmatpush.bf16.msra.mxu1 %v1642_v33  ;;  %v1630_v50 = vor.u32 %v2119_v42, %v1627_v43  ;;  %v2117_v51 = vld [vmem:[#allocation2 + $0x16c] sm:$0xf0]  ;;  %v2083_v52 = vld [vmem:[#allocation2 + $0x64] sm:$0xf]  ;;  %v1483_v53 = vld [vmem:[#allocation2 + $0x70] sm:$0xf0]  ;;  %v1482_v56 = vor.u32 %v2085_v48, %v1481_v47 }
  0x1b   :  { %512 = vmatpush.bf16.msra.mxu2 %v1518_v34  ;;  %v2115_v54 = vld [vmem:[#allocation2 + $0x164] sm:$0xf]  ;;  %v1611_v55 = vld [vmem:[#allocation2 + $0x170] sm:$0xf0]  ;;  %v1610_v57 = vor.u32 %v2117_v51, %v1609_v49  ;;  %v1486_v58 = vor.u32 %v2083_v52, %v1483_v53  ;;  %v1465_v59 = vld [vmem:[#allocation2 + $0x40] sm:$0xf] }
  0x1c   :  { %526 = vmatpush.bf16.msra.mxu3 %v1646_v38  ;;  %v2081_v60 = vld [vmem:[#allocation2 + $0x4c] sm:$0xf0]  ;;  %v1593_v61 = vld [vmem:[#allocation2 + $0x140] sm:$0xf]  ;;  %v1614_v62 = vor.u32 %v2115_v54, %v1611_v55  ;;  %v2079_v0 = vld [vmem:[#allocation2 + $0x44] sm:$0xf] }
  0x1d   :  { %485 = vmatpush.bf16.msra.mxu0 %v1498_v44  ;;  %v2113_v63 = vld [vmem:[#allocation2 + $0x14c] sm:$0xf0]  ;;  %v1467_v1 = vld [vmem:[#allocation2 + $0x50] sm:$0xf0]  ;;  %v2111_v2 = vld [vmem:[#allocation2 + $0x144] sm:$0xf]  ;;  %v1466_v4 = vor.u32 %v2081_v60, %v1465_v59 }
  0x1e   :  { %499 = vmatpush.bf16.msra.mxu1 %v1626_v45  ;;  %v1595_v3 = vld [vmem:[#allocation2 + $0x150] sm:$0xf0]  ;;  %v1594_v5 = vor.u32 %v2113_v63, %v1593_v61  ;;  %v1470_v6 = vor.u32 %v2079_v0, %v1467_v1  ;;  %v1449_v7 = vld [vmem:[#allocation2 + $0x20] sm:$0xf]  ;;  %v2077_v8 = vld [vmem:[#allocation2 + $0x2c] sm:$0xf0] }
  0x1f   :  { %513 = vmatpush.bf16.msra.mxu2 %v1502_v46  ;;  %v1577_v9 = vld [vmem:[#allocation2 + $0x120] sm:$0xf]  ;;  %v1598_v10 = vor.u32 %v2111_v2, %v1595_v3  ;;  %v2109_v11 = vld [vmem:[#allocation2 + $0x12c] sm:$0xf0]  ;;  %v2075_v12 = vld [vmem:[#allocation2 + $0x24] sm:$0xf]  ;;  %v1450_v16 = vor.u32 %v2077_v8, %v1449_v7 }
  0x20   :  { %527 = vmatpush.bf16.msra.mxu3 %v1630_v50  ;;  %v1451_v13 = vld [vmem:[#allocation2 + $0x30] sm:$0xf0]  ;;  %v2107_v14 = vld [vmem:[#allocation2 + $0x124] sm:$0xf]  ;;  %v1433_v17 = vld [vmem:[#allocation2] sm:$0xf]  ;;  %v1578_v20 = vor.u32 %v2109_v11, %v1577_v9 }
  0x21   :  { %486 = vmatpush.bf16.msra.mxu0 %v1482_v56  ;;  %v1579_v15 = vld [vmem:[#allocation2 + $0x130] sm:$0xf0]  ;;  %v2073_v18 = vld [vmem:[#allocation2 + $0xc] sm:$0xf0]  ;;  %v1561_v19 = vld [vmem:[#allocation2 + $0x100] sm:$0xf]  ;;  %v1454_v21 = vor.u32 %v2075_v12, %v1451_v13 }
  0x22   :  { %500 = vmatpush.bf16.msra.mxu1 %v1610_v57  ;;  %v2105_v22 = vld [vmem:[#allocation2 + $0x10c] sm:$0xf0]  ;;  %v2071_v23 = vld [vmem:[#allocation2 + $0x4] sm:$0xf]  ;;  %v1435_v24 = vld [vmem:[#allocation2 + $0x10] sm:$0xf0]  ;;  %v1582_v25 = vor.u32 %v2107_v14, %v1579_v15  ;;  %v1434_v32 = vor.u32 %v2073_v18, %v1433_v17 }
  0x23   :  { %514 = vmatpush.bf16.msra.mxu2 %v1486_v58  ;;  %v2103_v26 = vld [vmem:[#allocation2 + $0x104] sm:$0xf]  ;;  %v1563_v27 = vld [vmem:[#allocation2 + $0x110] sm:$0xf0]  ;;  %v1553_v28 = vld [vmem:[#allocation2 + $0xe8] sm:$0xf]  ;;  %v1562_v36 = vor.u32 %v2105_v22, %v1561_v19  ;;  %v1438_v37 = vor.u32 %v2071_v23, %v1435_v24 }
  0x24   :  { %528 = vmatpush.bf16.msra.mxu3 %v1614_v62  ;;  %v2102_v29 = vld [vmem:[#allocation2 + $0xf4] sm:$0xf0]  ;;  %v1681_v30 = vld [vmem:[#allocation2 + $0x1e8] sm:$0xf]  ;;  %v2100_v33 = vld [vmem:[#allocation2 + $0xec] sm:$0xf]  ;;  %v1566_v41 = vor.u32 %v2103_v26, %v1563_v27 }
  0x25   :  { %487 = vmatpush.bf16.msra.mxu0 %v1466_v4  ;;  %v2134_v31 = vld [vmem:[#allocation2 + $0x1f4] sm:$0xf0]  ;;  %v1555_v34 = vld [vmem:[#allocation2 + $0xf8] sm:$0xf0]  ;;  %v2132_v35 = vld [vmem:[#allocation2 + $0x1ec] sm:$0xf]  ;;  %v1554_v42 = vor.u32 %v2102_v29, %v1553_v28 }
  0x26   :  { %501 = vmatpush.bf16.msra.mxu1 %v1594_v5  ;;  %v1683_v38 = vld [vmem:[#allocation2 + $0x1f8] sm:$0xf0]  ;;  %v82_v39 = vld [vmem:[%s2510_s0] sm:$0xff]  ;;  %v84_v40 = vld [vmem:[%s2510_s0 + $0x10] sm:$0xff]  ;;  %v1682_v45 = vor.u32 %v2134_v31, %v1681_v30  ;;  %v1558_v46 = vor.u32 %v2100_v33, %v1555_v34 }
  0x27   :  { %515 = vmatpush.bf16.msra.mxu2 %v1470_v6  ;;  %v83_v43 = vld [vmem:[%s2510_s0 + $0x8] sm:$0xff]  ;;  %v85_v44 = vld [vmem:[%s2510_s0 + $0x18] sm:$0xff]  ;;  %v1686_v50 = vor.u32 %v2132_v35, %v1683_v38  ;;  %v2402_v51 = vpack.c.bf16 %v84_v40, %v82_v39 }
  0x28   :  { %529 = vmatpush.bf16.msra.mxu3 %v1598_v10  ;;  %v1537_v47 = vld [vmem:[#allocation2 + $0xc8] sm:$0xf]  ;;  %v2098_v48 = vld [vmem:[#allocation2 + $0xd4] sm:$0xf0]  ;;  %v2096_v53 = vld [vmem:[#allocation2 + $0xcc] sm:$0xf]  ;;  %v2404_v55 = vpack.c.bf16 %v85_v44, %v83_v43 }
  0x29   :  { %488 = vmatpush.bf16.msra.mxu0 %v1450_v16  ;;  %v1665_v49 = vld [vmem:[#allocation2 + $0x1c8] sm:$0xf]  ;;  %v2130_v52 = vld [vmem:[#allocation2 + $0x1d4] sm:$0xf0]  ;;  %v1539_v54 = vld [vmem:[#allocation2 + $0xd8] sm:$0xf0]  ;;  %v1538_v58 = vor.u32 %v2098_v48, %v1537_v47 }
  0x2a   :  { %502 = vmatpush.bf16.msra.mxu1 %v1578_v20  ;;  %v2128_v56 = vld [vmem:[#allocation2 + $0x1cc] sm:$0xf]  ;;  %v1667_v57 = vld [vmem:[#allocation2 + $0x1d8] sm:$0xf0]  ;;  %v1666_v59 = vor.u32 %v2130_v52, %v1665_v49  ;;  %v1542_v60 = vor.u32 %v2096_v53, %v1539_v54  ;;  %v1521_v61 = vld [vmem:[#allocation2 + $0xa8] sm:$0xf] }
  0x2b   :  { %516 = vmatpush.bf16.msra.mxu2 %v1454_v21  ;;  %v2094_v62 = vld [vmem:[#allocation2 + $0xb4] sm:$0xf0]  ;;  %v1649_v63 = vld [vmem:[#allocation2 + $0x1a8] sm:$0xf]  ;;  %v1670_v0 = vor.u32 %v2128_v56, %v1667_v57  ;;  %v2092_v2 = vld [vmem:[#allocation2 + $0xac] sm:$0xf] }
  0x2c   :  { %530 = vmatpush.bf16.msra.mxu3 %v1582_v25  ;;  %v2126_v1 = vld [vmem:[#allocation2 + $0x1b4] sm:$0xf0]  ;;  %v1523_v3 = vld [vmem:[#allocation2 + $0xb8] sm:$0xf0]  ;;  %v2124_v4 = vld [vmem:[#allocation2 + $0x1ac] sm:$0xf]  ;;  %v1522_v6 = vor.u32 %v2094_v62, %v1521_v61 }
  0x2d   :  { %489 = vmatpush.bf16.msra.mxu0 %v1434_v32  ;;  %v1651_v5 = vld [vmem:[#allocation2 + $0x1b8] sm:$0xf0]  ;;  %v1650_v7 = vor.u32 %v2126_v1, %v1649_v63  ;;  %v1526_v8 = vor.u32 %v2092_v2, %v1523_v3  ;;  %v1505_v9 = vld [vmem:[#allocation2 + $0x88] sm:$0xf]  ;;  %v2090_v10 = vld [vmem:[#allocation2 + $0x94] sm:$0xf0] }
  0x2e   :  { %503 = vmatpush.bf16.msra.mxu1 %v1562_v36  ;;  %v1633_v11 = vld [vmem:[#allocation2 + $0x188] sm:$0xf]  ;;  %v1654_v12 = vor.u32 %v2124_v4, %v1651_v5  ;;  %v2122_v13 = vld [vmem:[#allocation2 + $0x194] sm:$0xf0]  ;;  %v2088_v14 = vld [vmem:[#allocation2 + $0x8c] sm:$0xf]  ;;  %v1506_v18 = vor.u32 %v2090_v10, %v1505_v9 }
  0x2f   :  { %517 = vmatpush.bf16.msra.mxu2 %v1438_v37  ;;  %v1507_v15 = vld [vmem:[#allocation2 + $0x98] sm:$0xf0]  ;;  %v2120_v16 = vld [vmem:[#allocation2 + $0x18c] sm:$0xf]  ;;  %v1634_v19 = vor.u32 %v2122_v13, %v1633_v11  ;;  %v1489_v21 = vld [vmem:[#allocation2 + $0x68] sm:$0xf] }
  0x30   :  { %531 = vmatpush.bf16.msra.mxu3 %v1566_v41  ;;  %490 = vmatmul.bf16.vlgmr.msra.gmra.mxu0 %v2402_v51  ;;  %v1635_v17 = vld [vmem:[#allocation2 + $0x198] sm:$0xf0]  ;;  %v1510_v20 = vor.u32 %v2088_v14, %v1507_v15  ;;  %v2086_v22 = vld [vmem:[#allocation2 + $0x74] sm:$0xf0]  ;;  %v1617_v23 = vld [vmem:[#allocation2 + $0x168] sm:$0xf] }
  0x31   :  { %538 = vmatpush.bf16.msrb.mxu0 %v1554_v42  ;;  %504 = vmatmul.bf16.vlgmr.msra.gmra.mxu1 %v2404_v55  ;;  %v1638_v24 = vor.u32 %v2120_v16, %v1635_v17  ;;  %v2118_v25 = vld [vmem:[#allocation2 + $0x174] sm:$0xf0]  ;;  %v2084_v26 = vld [vmem:[#allocation2 + $0x6c] sm:$0xf]  ;;  %v1491_v27 = vld [vmem:[#allocation2 + $0x78] sm:$0xf0]  ;;  %v1490_v30 = vor.u32 %v2086_v22, %v1489_v21 }
  0x32   :  { %552 = vmatpush.bf16.msrb.mxu1 %v1682_v45  ;;  %518 = vmatmul.bf16.vlgmr.msra.gmra.mxu2 %v2402_v51  ;;  %v2116_v28 = vld [vmem:[#allocation2 + $0x16c] sm:$0xf]  ;;  %v1619_v29 = vld [vmem:[#allocation2 + $0x178] sm:$0xf0]  ;;  %v1618_v31 = vor.u32 %v2118_v25, %v1617_v23  ;;  %v1494_v32 = vor.u32 %v2084_v26, %v1491_v27  ;;  %v1473_v33 = vld [vmem:[#allocation2 + $0x48] sm:$0xf] }
  0x33   :  { %566 = vmatpush.bf16.msrb.mxu2 %v1558_v46  ;;  %532 = vmatmul.bf16.vlgmr.msra.gmra.mxu3 %v2404_v55  ;;  %v2082_v34 = vld [vmem:[#allocation2 + $0x54] sm:$0xf0]  ;;  %v1601_v35 = vld [vmem:[#allocation2 + $0x148] sm:$0xf]  ;;  %v1622_v36 = vor.u32 %v2116_v28, %v1619_v29  ;;  %v2080_v38 = vld [vmem:[#allocation2 + $0x4c] sm:$0xf] }
  0x34   :  { %580 = vmatpush.bf16.msrb.mxu3 %v1686_v50  ;;  %v2114_v37 = vld [vmem:[#allocation2 + $0x154] sm:$0xf0]  ;;  %v1475_v39 = vld [vmem:[#allocation2 + $0x58] sm:$0xf0]  ;;  %v2112_v40 = vld [vmem:[#allocation2 + $0x14c] sm:$0xf]  ;;  %v1474_v42 = vor.u32 %v2082_v34, %v1473_v33 }
  0x35   :  { %539 = vmatpush.bf16.msrb.mxu0 %v1538_v58  ;;  %v1603_v41 = vld [vmem:[#allocation2 + $0x158] sm:$0xf0]  ;;  %v1457_v43 = vld [vmem:[#allocation2 + $0x28] sm:$0xf]  ;;  %v1602_v44 = vor.u32 %v2114_v37, %v1601_v35  ;;  %v1478_v45 = vor.u32 %v2080_v38, %v1475_v39  ;;  %v2078_v46 = vld [vmem:[#allocation2 + $0x34] sm:$0xf0] }
  0x36   :  { %553 = vmatpush.bf16.msrb.mxu1 %v1666_v59  ;;  %v1585_v47 = vld [vmem:[#allocation2 + $0x128] sm:$0xf]  ;;  %v1606_v48 = vor.u32 %v2112_v40, %v1603_v41  ;;  %v2110_v49 = vld [vmem:[#allocation2 + $0x134] sm:$0xf0]  ;;  %v2076_v50 = vld [vmem:[#allocation2 + $0x2c] sm:$0xf]  ;;  %v1458_v56 = vor.u32 %v2078_v46, %v1457_v43 }
  0x37   :  { %567 = vmatpush.bf16.msrb.mxu2 %v1542_v60  ;;  %v1459_v52 = vld [vmem:[#allocation2 + $0x38] sm:$0xf0]  ;;  %v2108_v53 = vld [vmem:[#allocation2 + $0x12c] sm:$0xf]  ;;  %v1441_v57 = vld [vmem:[#allocation2 + $0x8] sm:$0xf]  ;;  %v1586_v58 = vor.u32 %v2110_v49, %v1585_v47 }
  0x38   :  { %581 = vmatpush.bf16.msrb.mxu3 %v1670_v0  ;;  %v1587_v54 = vld [vmem:[#allocation2 + $0x138] sm:$0xf0]  ;;  %v1462_v59 = vor.u32 %v2076_v50, %v1459_v52  ;;  %v2074_v60 = vld [vmem:[#allocation2 + $0x14] sm:$0xf0]  ;;  %v1569_v61 = vld [vmem:[#allocation2 + $0x108] sm:$0xf] }
  0x39   :  { %540 = vmatpush.bf16.msrb.mxu0 %v1522_v6  ;;  %v2106_v62 = vld [vmem:[#allocation2 + $0x114] sm:$0xf0]  ;;  %v1590_v63 = vor.u32 %v2108_v53, %v1587_v54  ;;  %v2072_v0 = vld [vmem:[#allocation2 + $0xc] sm:$0xf]  ;;  %v1443_v1 = vld [vmem:[#allocation2 + $0x18] sm:$0xf0]  ;;  %v1442_v6 = vor.u32 %v2074_v60, %v1441_v57 }
  0x3a   :  { %554 = vmatpush.bf16.msrb.mxu1 %v1650_v7  ;;  %v2104_v2 = vld [vmem:[#allocation2 + $0x10c] sm:$0xf]  ;;  %v1571_v3 = vld [vmem:[#allocation2 + $0x118] sm:$0xf0]  ;;  %v1745_v4 = vld [vmem:[#allocation4 + $0x70] sm:$0xf]  ;;  %v1570_v9 = vor.u32 %v2106_v62, %v1569_v61  ;;  %v1446_v10 = vor.u32 %v2072_v0, %v1443_v1 }
  0x3b   :  { %568 = vmatpush.bf16.msrb.mxu2 %v1526_v8  ;;  %v2150_v5 = vld [vmem:[#allocation4 + $0x74] sm:$0xf0]  ;;  %v1809_v7 = vld [vmem:[#allocation4 + $0xf0] sm:$0xf]  ;;  %v1574_v11 = vor.u32 %v2104_v2, %v1571_v3  ;;  %v1737_v13 = vld [vmem:[#allocation4 + $0x60] sm:$0xf] }
  0x3c   :  { %582 = vmatpush.bf16.msrb.mxu3 %v1654_v12  ;;  %v2166_v8 = vld [vmem:[#allocation4 + $0xf4] sm:$0xf0]  ;;  %v1746_v12 = vor.u32 %v2150_v5, %v1745_v4  ;;  %v2148_v14 = vld [vmem:[#allocation4 + $0x64] sm:$0xf0]  ;;  %v1801_v16 = vld [vmem:[#allocation4 + $0xe0] sm:$0xf] }
  0x3d   :  { %541 = vmatpush.bf16.msrb.mxu0 %v1506_v18  ;;  %v1810_v15 = vor.u32 %v2166_v8, %v1809_v7  ;;  %v2164_v17 = vld [vmem:[#allocation4 + $0xe4] sm:$0xf0]  ;;  %v1738_v18 = vor.u32 %v2148_v14, %v1737_v13  ;;  %v1793_v22 = vld [vmem:[#allocation4 + $0xd0] sm:$0xf]  ;;  %v2162_v23 = vld [vmem:[#allocation4 + $0xd4] sm:$0xf0] }
  0x3e   :  { %555 = vmatpush.bf16.msrb.mxu1 %v1634_v19  ;;  %v1729_v19 = vld [vmem:[#allocation4 + $0x50] sm:$0xf]  ;;  %v1802_v21 = vor.u32 %v2164_v17, %v1801_v16  ;;  %v1721_v25 = vld [vmem:[#allocation4 + $0x40] sm:$0xf]  ;;  %v2144_v26 = vld [vmem:[#allocation4 + $0x44] sm:$0xf0]  ;;  %v1794_v27 = vor.u32 %v2162_v23, %v1793_v22 }
  0x3f   :  { %569 = vmatpush.bf16.msrb.mxu2 %v1510_v20  ;;  %v2146_v20 = vld [vmem:[#allocation4 + $0x54] sm:$0xf0]  ;;  %v1785_v28 = vld [vmem:[#allocation4 + $0xc0] sm:$0xf]  ;;  %v2160_v29 = vld [vmem:[#allocation4 + $0xc4] sm:$0xf0] }
  0x40   :  { %583 = vmatpush.bf16.msrb.mxu3 %v1638_v24  ;;  %v1730_v24 = vor.u32 %v2146_v20, %v1729_v19  ;;  %v1786_v33 = vor.u32 %v2160_v29, %v1785_v28  ;;  %v1777_v34 = vld [vmem:[#allocation4 + $0xb0] sm:$0xf]  ;;  %v1769_v38 = vld [vmem:[#allocation4 + $0xa0] sm:$0xf]  ;;  %v2156_v39 = vld [vmem:[#allocation4 + $0xa4] sm:$0xf0] }
  0x41   :  { %542 = vmatpush.bf16.msrb.mxu0 %v1490_v30  ;;  %v1722_v30 = vor.u32 %v2144_v26, %v1721_v25  ;;  %v1697_v41 = vld [vmem:[#allocation4 + $0x10] sm:$0xf]  ;;  %v1770_v43 = vor.u32 %v2156_v39, %v1769_v38  ;;  %v2136_v46 = vld [vmem:[#allocation4 + $0x4] sm:$0xf0]  ;;  %v2182_v49 = vld [vmem:[#allocation4 + $0x174] sm:$0xf0] }
  0x42   :  { %556 = vmatpush.bf16.msrb.mxu1 %v1618_v31  ;;  %v1713_v31 = vld [vmem:[#allocation4 + $0x30] sm:$0xf]  ;;  %v2149_v50 = vld [vmem:[#allocation4 + $0x74] sm:$0xf]  ;;  %v1747_v53 = vld [vmem:[#allocation4 + $0x78] sm:$0xf0] }
  0x43   :  { %570 = vmatpush.bf16.msrb.mxu2 %v1494_v32  ;;  %v2142_v32 = vld [vmem:[#allocation4 + $0x34] sm:$0xf0]  ;;  %v1761_v54 = vld [vmem:[#allocation4 + $0x90] sm:$0xf]  ;;  %v1750_v57 = vor.u32 %v2149_v50, %v1747_v53  ;;  %v2180_v60 = vld [vmem:[#allocation4 + $0x164] sm:$0xf0] }
  0x44   :  { %584 = vmatpush.bf16.msrb.mxu3 %v1622_v36  ;;  %v1714_v35 = vor.u32 %v2142_v32, %v1713_v31  ;;  %v2140_v36 = vld [vmem:[#allocation4 + $0x24] sm:$0xf0]  ;;  %v2147_v62 = vld [vmem:[#allocation4 + $0x64] sm:$0xf]  ;;  %v1753_v0 = vld [vmem:[#allocation4 + $0x80] sm:$0xf] }
  0x45   :  { %543 = vmatpush.bf16.msrb.mxu0 %v1474_v42  ;;  %v2138_v42 = vld [vmem:[#allocation4 + $0x14] sm:$0xf0]  ;;  %v2152_v2 = vld [vmem:[#allocation4 + $0x84] sm:$0xf0]  ;;  %v1937_v3 = vld [vmem:[#allocation4 + $0x1f0] sm:$0xf] }
  0x46   :  { %557 = vmatpush.bf16.msrb.mxu1 %v1602_v44  ;;  %v1698_v44 = vor.u32 %v2138_v42, %v1697_v41  ;;  %v2198_v4 = vld [vmem:[#allocation4 + $0x1f4] sm:$0xf0]  ;;  %v1754_v5 = vor.u32 %v2152_v2, %v1753_v0  ;;  %v2165_v7 = vld [vmem:[#allocation4 + $0xf4] sm:$0xf]  ;;  %v1811_v8 = vld [vmem:[#allocation4 + $0xf8] sm:$0xf0] }
  0x47   :  { %571 = vmatpush.bf16.msrb.mxu2 %v1478_v45  ;;  %v1689_v45 = vld [vmem:[#allocation4] sm:$0xf]  ;;  %v1731_v14 = vld [vmem:[#allocation4 + $0x58] sm:$0xf0]  ;;  %v2196_v17 = vld [vmem:[#allocation4 + $0x1e4] sm:$0xf0] }
  0x48   :  { %585 = vmatpush.bf16.msrb.mxu3 %v1606_v48  ;;  %v1690_v47 = vor.u32 %v2136_v46, %v1689_v45  ;;  %v1873_v48 = vld [vmem:[#allocation4 + $0x170] sm:$0xf]  ;;  %v1929_v16 = vld [vmem:[#allocation4 + $0x1e0] sm:$0xf]  ;;  %v1803_v20 = vld [vmem:[#allocation4 + $0xe8] sm:$0xf0] }
  0x49   :  { %544 = vmatpush.bf16.msrb.mxu0 %v1458_v56  ;;  %v1874_v52 = vor.u32 %v2182_v49, %v1873_v48  ;;  %v2154_v56 = vld [vmem:[#allocation4 + $0x94] sm:$0xf0]  ;;  %v1930_v19 = vor.u32 %v2196_v17, %v1929_v16  ;;  %v1849_v22 = vld [vmem:[#allocation4 + $0x140] sm:$0xf]  ;;  %v2176_v23 = vld [vmem:[#allocation4 + $0x144] sm:$0xf0] }
  0x4a   :  { %558 = vmatpush.bf16.msrb.mxu1 %v1586_v58  ;;  %v1762_v58 = vor.u32 %v2154_v56, %v1761_v54  ;;  %v1850_v25 = vor.u32 %v2176_v23, %v1849_v22  ;;  %v1723_v26 = vld [vmem:[#allocation4 + $0x48] sm:$0xf0]  ;;  %v1921_v28 = vld [vmem:[#allocation4 + $0x1d0] sm:$0xf]  ;;  %v2194_v29 = vld [vmem:[#allocation4 + $0x1d4] sm:$0xf0] }
  0x4b   :  { %572 = vmatpush.bf16.msrb.mxu2 %v1462_v59  ;;  %v1865_v59 = vld [vmem:[#allocation4 + $0x160] sm:$0xf]  ;;  %v1922_v31 = vor.u32 %v2194_v29, %v1921_v28  ;;  %v1795_v32 = vld [vmem:[#allocation4 + $0xd8] sm:$0xf0]  ;;  %v2192_v39 = vld [vmem:[#allocation4 + $0x1c4] sm:$0xf0] }
  0x4c   :  { %586 = vmatpush.bf16.msrb.mxu3 %v1590_v63  ;;  %v1866_v61 = vor.u32 %v2180_v60, %v1865_v59  ;;  %v1739_v63 = vld [vmem:[#allocation4 + $0x68] sm:$0xf0]  ;;  %v1913_v38 = vld [vmem:[#allocation4 + $0x1c0] sm:$0xf]  ;;  %v2172_v45 = vld [vmem:[#allocation4 + $0x124] sm:$0xf0] }
  0x4d   :  { %545 = vmatpush.bf16.msrb.mxu0 %v1442_v6  ;;  %v1742_v1 = vor.u32 %v2147_v62, %v1739_v63  ;;  %v1938_v6 = vor.u32 %v2198_v4, %v1937_v3  ;;  %v1914_v41 = vor.u32 %v2192_v39, %v1913_v38  ;;  %v1787_v42 = vld [vmem:[#allocation4 + $0xc8] sm:$0xf0]  ;;  %v2139_v46 = vld [vmem:[#allocation4 + $0x24] sm:$0xf]  ;;  %v2417_v49 = vld [vmem:[%s2513_s3] sm:$0xf] }
  0x4e   :  { %559 = vmatpush.bf16.msrb.mxu1 %v1570_v9  ;;  %v1814_v9 = vor.u32 %v2165_v7, %v1811_v8  ;;  %v1707_v48 = vld [vmem:[#allocation4 + $0x28] sm:$0xf0]  ;;  %v2190_v53 = vld [vmem:[#allocation4 + $0x1b4] sm:$0xf0]  ;;  %v2157_v54 = vld [vmem:[#allocation4 + $0xb4] sm:$0xf] }
  0x4f   :  { %573 = vmatpush.bf16.msrb.mxu2 %v1446_v10  ;;  %v1857_v10 = vld [vmem:[#allocation4 + $0x150] sm:$0xf]  ;;  %v1710_v50 = vor.u32 %v2139_v46, %v1707_v48  ;;  %v2170_v59 = vld [vmem:[#allocation4 + $0x114] sm:$0xf0]  ;;  %v2137_v62 = vld [vmem:[#allocation4 + $0x14] sm:$0xf] }
  0x50   :  { %587 = vmatpush.bf16.msrb.mxu3 %v1574_v11  ;;  %546 = vmatmul.bf16.vlgmr.msrb.gmra.mxu0 %v2402_v51  ;;  %v2178_v11 = vld [vmem:[#allocation4 + $0x154] sm:$0xf0]  ;;  %v1699_v63 = vld [vmem:[#allocation4 + $0x18] sm:$0xf0]  ;;  %v1897_v0 = vld [vmem:[#allocation4 + $0x1a0] sm:$0xf] }
  0x51   :  { %996 = vmatpush.bf16.msra.mxu0 %v1746_v12  ;;  %560 = vmatmul.bf16.vlgmr.msrb.gmra.mxu1 %v2404_v55  ;;  %v2145_v12 = vld [vmem:[#allocation4 + $0x54] sm:$0xf]  ;;  %v1858_v13 = vor.u32 %v2178_v11, %v1857_v10  ;;  %v2188_v2 = vld [vmem:[#allocation4 + $0x1a4] sm:$0xf0]  ;;  %v2155_v3 = vld [vmem:[#allocation4 + $0xa4] sm:$0xf] }
  0x52   :  { %1010 = vmatpush.bf16.msra.mxu1 %v1810_v15  ;;  %574 = vmatmul.bf16.vlgmr.msrb.gmra.mxu2 %v2402_v51  ;;  %v2158_v51 = vld [vmem:[#allocation4 + $0xb4] sm:$0xf0]  ;;  %v1734_v15 = vor.u32 %v2145_v12, %v1731_v14  ;;  %v1771_v4 = vld [vmem:[#allocation4 + $0xa8] sm:$0xf0]  ;;  %v154_v7 = vperm.slane %v2417_v49, 0 }
  0x53   :  { %588 = vmatmul.bf16.vlgmr.msrb.gmra.mxu3 %v2404_v55  ;;  %v1705_v55 = vld [vmem:[#allocation4 + $0x20] sm:$0xf]  ;;  %v1778_v37 = vor.u32 %v2158_v51, %v1777_v34  ;;  %1024 = vmatpush.bf16.msra.mxu2 %v1874_v52  ;;  %v1841_v34 = vld [vmem:[#allocation4 + $0x130] sm:$0xf]  ;;  %v2174_v51 = vld [vmem:[#allocation4 + $0x134] sm:$0xf0] }
  0x54   :  { %v1706_v40 = vor.u32 %v2140_v36, %v1705_v55  ;;  %1038 = vmatpush.bf16.msra.mxu3 %v1938_v6  ;;  %v1842_v55 = vor.u32 %v2174_v51, %v1841_v34  ;;  %v1715_v36 = vld [vmem:[#allocation4 + $0x38] sm:$0xf0]  ;;  %v1905_v52 = vld [vmem:[#allocation4 + $0x1b0] sm:$0xf]  ;;  %v1774_v6 = vor.u32 %v2155_v3, %v1771_v4  ;;  %v1817_v8 = vld [vmem:[#allocation4 + $0x100] sm:$0xf] }
  0x55   :  { %997 = vmatpush.bf16.msra.mxu0 %v1738_v18  ;;  %v2163_v18 = vld [vmem:[#allocation4 + $0xe4] sm:$0xf]  ;;  %v1906_v56 = vor.u32 %v2190_v53, %v1905_v52  ;;  %v1691_v12 = vld [vmem:[#allocation4 + $0x8] sm:$0xf0]  ;;  %v1875_v14 = vld [vmem:[#allocation4 + $0x178] sm:$0xf0] }
  0x56   :  { %1011 = vmatpush.bf16.msra.mxu1 %v1802_v21  ;;  %v1806_v21 = vor.u32 %v2163_v18, %v1803_v20  ;;  %v2135_v10 = vld [vmem:[#allocation4 + $0x4] sm:$0xf]  ;;  %v1889_v17 = vld [vmem:[#allocation4 + $0x190] sm:$0xf]  ;;  %v2186_v18 = vld [vmem:[#allocation4 + $0x194] sm:$0xf0] }
  0x57   :  { %1025 = vmatpush.bf16.msra.mxu2 %v1866_v61  ;;  %v1763_v22 = vld [vmem:[#allocation4 + $0x98] sm:$0xf0]  ;;  %v1881_v29 = vld [vmem:[#allocation4 + $0x180] sm:$0xf]  ;;  %v2197_v34 = vld [vmem:[#allocation4 + $0x1f4] sm:$0xf] }
  0x58   :  { %1039 = vmatpush.bf16.msra.mxu3 %v1930_v19  ;;  %v2153_v19 = vld [vmem:[#allocation4 + $0x94] sm:$0xf]  ;;  %v1939_v51 = vld [vmem:[#allocation4 + $0x1f8] sm:$0xf0]  ;;  %v2175_v52 = vld [vmem:[#allocation4 + $0x144] sm:$0xf] }
  0x59   :  { %998 = vmatpush.bf16.msra.mxu0 %v1730_v24  ;;  %v2143_v24 = vld [vmem:[#allocation4 + $0x44] sm:$0xf]  ;;  %v1859_v38 = vld [vmem:[#allocation4 + $0x158] sm:$0xf0]  ;;  %v1851_v53 = vld [vmem:[#allocation4 + $0x148] sm:$0xf0] }
  0x5a   :  { %1012 = vmatpush.bf16.msra.mxu1 %v1794_v27  ;;  %v1726_v27 = vor.u32 %v2143_v24, %v1723_v26  ;;  %v1766_v24 = vor.u32 %v2153_v19, %v1763_v22  ;;  %v1867_v26 = vld [vmem:[#allocation4 + $0x168] sm:$0xf0]  ;;  %v1827_v19 = vld [vmem:[#allocation4 + $0x118] sm:$0xf0] }
  0x5b   :  { %1026 = vmatpush.bf16.msra.mxu2 %v1858_v13  ;;  %v2181_v13 = vld [vmem:[#allocation4 + $0x174] sm:$0xf] }
  0x5c   :  { %1040 = vmatpush.bf16.msra.mxu3 %v1922_v31  ;;  %v1878_v16 = vor.u32 %v2181_v13, %v1875_v14  ;;  %v2151_v31 = vld [vmem:[#allocation4 + $0x84] sm:$0xf] }
  0x5d   :  { %999 = vmatpush.bf16.msra.mxu0 %v1722_v30  ;;  %v2161_v30 = vld [vmem:[#allocation4 + $0xd4] sm:$0xf] }
  0x5e   :  { %1013 = vmatpush.bf16.msra.mxu1 %v1786_v33  ;;  %v1798_v33 = vor.u32 %v2161_v30, %v1795_v32  ;;  %v2184_v30 = vld [vmem:[#allocation4 + $0x184] sm:$0xf0] }
  0x5f   :  { %1027 = vmatpush.bf16.msra.mxu2 %v1850_v25  ;;  %v2179_v25 = vld [vmem:[#allocation4 + $0x164] sm:$0xf]  ;;  %v1882_v32 = vor.u32 %v2184_v30, %v1881_v29 }
  0x60   :  { %1041 = vmatpush.bf16.msra.mxu3 %v1914_v41  ;;  %v1870_v28 = vor.u32 %v2179_v25, %v1867_v26  ;;  %v1819_v25 = vld [vmem:[#allocation4 + $0x108] sm:$0xf0] }
  0x61   :  { %1000 = vmatpush.bf16.msra.mxu0 %v1714_v35  ;;  %v2141_v35 = vld [vmem:[#allocation4 + $0x34] sm:$0xf] }
  0x62   :  { %1014 = vmatpush.bf16.msra.mxu1 %v1778_v37  ;;  %v1718_v37 = vor.u32 %v2141_v35, %v1715_v36  ;;  %v155_v36 = vperm.slane %v2417_v49, 1 }
  0x63   :  { %1028 = vmatpush.bf16.msra.mxu2 %v1842_v55  ;;  %v1942_v55 = vor.u32 %v2197_v34, %v1939_v51  ;;  %v2183_v34 = vld [vmem:[#allocation4 + $0x184] sm:$0xf]  ;;  %v1883_v51 = vld [vmem:[#allocation4 + $0x188] sm:$0xf0] }
  0x64   :  { %1042 = vmatpush.bf16.msra.mxu3 %v1906_v56 }
  0x65   :  { %1001 = vmatpush.bf16.msra.mxu0 %v1706_v40  ;;  %v2159_v40 = vld [vmem:[#allocation4 + $0xc4] sm:$0xf] }
  0x66   :  { %1015 = vmatpush.bf16.msra.mxu1 %v1770_v43  ;;  %v1790_v43 = vor.u32 %v2159_v40, %v1787_v42 }
  0x69   :  { %1002 = vmatpush.bf16.msra.mxu0 %v1698_v44  ;;  %v1833_v44 = vld [vmem:[#allocation4 + $0x120] sm:$0xf] }
  0x6a   :  { %1016 = vmatpush.bf16.msra.mxu1 %v1762_v58  ;;  %v1825_v58 = vld [vmem:[#allocation4 + $0x110] sm:$0xf] }
  0x6b   :  { %v1826_v61 = vor.u32 %v2170_v59, %v1825_v58  ;;  %v2193_v58 = vld [vmem:[#allocation4 + $0x1d4] sm:$0xf]  ;;  %v1923_v59 = vld [vmem:[#allocation4 + $0x1d8] sm:$0xf0] }
  0x6d   :  { %1003 = vmatpush.bf16.msra.mxu0 %v1690_v47  ;;  %v1834_v47 = vor.u32 %v2172_v45, %v1833_v44  ;;  %v2195_v44 = vld [vmem:[#allocation4 + $0x1e4] sm:$0xf]  ;;  %v1931_v45 = vld [vmem:[#allocation4 + $0x1e8] sm:$0xf0] }
  0x6e   :  { %1017 = vmatpush.bf16.msra.mxu1 %v1754_v5  ;;  %v1898_v5 = vor.u32 %v2188_v2, %v1897_v0  ;;  %v1934_v48 = vor.u32 %v2195_v44, %v1931_v45  ;;  %v1843_v0 = vld [vmem:[#allocation4 + $0x138] sm:$0xf0] }
  0x6f   :  { %1029 = vmatpush.bf16.msra.mxu2 %v1834_v47 }
  0x70   :  { %1043 = vmatpush.bf16.msra.mxu3 %v1898_v5 }
  0x71   :  { %1052 = vmatpush.bf16.msrb.mxu0 %v1750_v57  ;;  %v1779_v57 = vld [vmem:[#allocation4 + $0xb8] sm:$0xf0] }
  0x72   :  { %1066 = vmatpush.bf16.msrb.mxu1 %v1814_v9  ;;  %v1782_v60 = vor.u32 %v2157_v54, %v1779_v57  ;;  %v2168_v9 = vld [vmem:[#allocation4 + $0x104] sm:$0xf0]  ;;  %v1854_v57 = vor.u32 %v2175_v52, %v1851_v53 }
  0x73   :  { %1030 = vmatpush.bf16.msra.mxu2 %v1826_v61  ;;  %v1818_v11 = vor.u32 %v2168_v9, %v1817_v8  ;;  %v1926_v61 = vor.u32 %v2193_v58, %v1923_v59  ;;  %v2206_v58 = vld [vmem:[%s2516_s6 + $0x38] sm:$0xff]  ;;  %v2205_v59 = vld [vmem:[%s2516_s6 + $0x30] sm:$0xff] }
  0x75   :  { %1053 = vmatpush.bf16.msrb.mxu0 %v1742_v1  ;;  %v1702_v1 = vor.u32 %v2137_v62, %v1699_v63  ;;  %v2173_v63 = vld [vmem:[#allocation4 + $0x134] sm:$0xf] }
  0x76   :  { %1067 = vmatpush.bf16.msrb.mxu1 %v1806_v21  ;;  %v1890_v21 = vor.u32 %v2186_v18, %v1889_v17  ;;  %v1846_v3 = vor.u32 %v2173_v63, %v1843_v0  ;;  %v2169_v18 = vld [vmem:[#allocation4 + $0x114] sm:$0xf]  ;;  %v2214_v63 = vld [vmem:[%s2516_s6 + $0x78] sm:$0xff] }
  0x77   :  { %1031 = vmatpush.bf16.msra.mxu2 %v1818_v11  ;;  %v2171_v11 = vld [vmem:[#allocation4 + $0x124] sm:$0xf]  ;;  %v1830_v22 = vor.u32 %v2169_v18, %v1827_v19  ;;  %v2201_v0 = vld [vmem:[%s2516_s6 + $0x10] sm:$0xff] }
  0x78   :  { %1044 = vmatpush.bf16.msra.mxu3 %v1890_v21 }
  0x79   :  { %1054 = vmatpush.bf16.msrb.mxu0 %v1734_v15  ;;  %v1694_v15 = vor.u32 %v2135_v10, %v1691_v12  ;;  %v1835_v12 = vld [vmem:[#allocation4 + $0x128] sm:$0xf0] }
  0x7a   :  { %1068 = vmatpush.bf16.msrb.mxu1 %v1798_v33  ;;  %v1755_v33 = vld [vmem:[#allocation4 + $0x88] sm:$0xf0]  ;;  %v1838_v13 = vor.u32 %v2171_v11, %v1835_v12  ;;  %v670_v11 = vld [vmem:[%s2515_s5] sm:$0x3] }
  0x7b   :  { %1080 = vmatpush.bf16.msrb.mxu2 %v1878_v16  ;;  %v1758_v35 = vor.u32 %v2151_v31, %v1755_v33  ;;  %v1907_v16 = vld [vmem:[#allocation4 + $0x1b8] sm:$0xf0] }
  0x7c   :  { %1045 = vmatpush.bf16.msra.mxu3 %v1882_v32  ;;  %v156_v32 = vperm.slane %v2417_v49, 2 }
  0x7d   :  { %1055 = vmatpush.bf16.msrb.mxu0 %v1726_v27 }
  0x7e   :  { %1069 = vmatpush.bf16.msrb.mxu1 %v1790_v43 }
  0x7f   :  { %1081 = vmatpush.bf16.msrb.mxu2 %v1870_v28  ;;  %v1891_v28 = vld [vmem:[#allocation4 + $0x198] sm:$0xf0] }
  0x80   :  { %1094 = vmatpush.bf16.msrb.mxu3 %v1942_v55 }
  0x81   :  { %1056 = vmatpush.bf16.msrb.mxu0 %v1718_v37  ;;  %v2177_v37 = vld [vmem:[#allocation4 + $0x154] sm:$0xf] }
  0x82   :  { %1070 = vmatpush.bf16.msrb.mxu1 %v1782_v60  ;;  %v1862_v41 = vor.u32 %v2177_v37, %v1859_v38  ;;  %v157_v37 = vperm.slane %v2417_v49, 3 }
  0x84   :  { %1082 = vmatpush.bf16.msrb.mxu2 %v1862_v41  ;;  %1095 = vmatpush.bf16.msrb.mxu3 %v1934_v48 }
  0x85   :  { %1057 = vmatpush.bf16.msrb.mxu0 %v1710_v50 }
  0x86   :  { %1071 = vmatpush.bf16.msrb.mxu1 %v1774_v6  ;;  %v2191_v6 = vld [vmem:[#allocation4 + $0x1c4] sm:$0xf] }
  0x88   :  { %1083 = vmatpush.bf16.msrb.mxu2 %v1854_v57  ;;  %1096 = vmatpush.bf16.msrb.mxu3 %v1926_v61  ;;  %v2203_v61 = vld [vmem:[%s2516_s6 + $0x20] sm:$0xff] }
  0x89   :  { %1058 = vmatpush.bf16.msrb.mxu0 %v1702_v1 }
  0x8a   :  { %1072 = vmatpush.bf16.msrb.mxu1 %v1766_v24  ;;  %v2167_v24 = vld [vmem:[#allocation4 + $0x104] sm:$0xf] }
  0x8b   :  { %v1822_v29 = vor.u32 %v2167_v24, %v1819_v25 }
  0x8c   :  { %1084 = vmatpush.bf16.msrb.mxu2 %v1846_v3  ;;  %v2212_v3 = vld [vmem:[%s2516_s6 + $0x68] sm:$0xff] }
  0x8d   :  { %1059 = vmatpush.bf16.msrb.mxu0 %v1694_v15  ;;  %v2189_v15 = vld [vmem:[#allocation4 + $0x1b4] sm:$0xf] }
  0x8e   :  { %1073 = vmatpush.bf16.msrb.mxu1 %v1758_v35  ;;  %v1910_v17 = vor.u32 %v2189_v15, %v1907_v16  ;;  %v1886_v35 = vor.u32 %v2183_v34, %v1883_v51 }
  0x90   :  { %1085 = vmatpush.bf16.msrb.mxu2 %v1838_v13  ;;  %v672_v13 = vperm.slane %v670_v11, 0 }
  0x94   :  { %1086 = vmatpush.bf16.msrb.mxu2 %v1830_v22 }
  0x98   :  { %1087 = vmatpush.bf16.msrb.mxu2 %v1822_v29 }
  0xad   :  { %v491_v20 = vpop.f32.mrf.mxu0 }
  0xae   :  { %v505_v23 = vpop.f32.mrf.mxu1  ;;  %v492_v27 = vadd.f32 %v491_v20, %v154_v7  ;;  %v2187_v20 = vld [vmem:[#allocation4 + $0x1a4] sm:$0xf] }
  0xb0   :  { %v506_v39 = vadd.f32 %v505_v23, %v492_v27  ;;  %v1899_v23 = vld [vmem:[#allocation4 + $0x1a8] sm:$0xf0]  ;;  %v2185_v27 = vld [vmem:[#allocation4 + $0x194] sm:$0xf] }
  0xb1   :  { %v1902_v26 = vor.u32 %v2187_v20, %v1899_v23  ;;  %v1894_v30 = vor.u32 %v2185_v27, %v1891_v28 }
  0xb2   :  { %v594_v54 = vmax.f32 %v506_v39, 0.0 }
  0xb5   :  { %v519_v40 = vpop.f32.mrf.mxu2  ;;  %v493_v42 = vpop.f32.mrf.mxu0 }
  0xb6   :  { %v533_v43 = vpop.f32.mrf.mxu3  ;;  %v494_v46 = vadd.f32 %v493_v42, %v154_v7  ;;  %v507_v47 = vpop.f32.mrf.mxu1  ;;  %v520_v50 = vadd.f32 %v519_v40, %v155_v36  ;;  %v1915_v7 = vld [vmem:[#allocation4 + $0x1c8] sm:$0xf0] }
  0xb7   :  { %v1918_v8 = vor.u32 %v2191_v6, %v1915_v7  ;;  %v2210_v6 = vld [vmem:[%s2516_s6 + $0x58] sm:$0xff] }
  0xb8   :  { %v508_v56 = vadd.f32 %v507_v47, %v494_v46  ;;  %v534_v62 = vadd.f32 %v533_v43, %v520_v50 }
  0xb9   :  { %1097 = vmatpush.bf16.msrb.mxu3 %v1918_v8  ;;  %v2209_v8 = vld [vmem:[%s2516_s6 + $0x50] sm:$0xff] }
  0xba   :  { %v598_v60 = vmax.f32 %v508_v56, 0.0  ;;  %v595_v9 = vmax.f32 %v534_v62, 0.0  ;;  %v2202_v62 = vld [vmem:[%s2516_s6 + $0x18] sm:$0xff] }
  0xbc   :  { %v602_v1 = vpack.c.bf16 %v598_v60, %v594_v54  ;;  %v2204_v60 = vld [vmem:[%s2516_s6 + $0x28] sm:$0xff] }
  0xbd   :  { %v521_v2 = vpop.f32.mrf.mxu2  ;;  %1098 = vmatpush.bf16.msrb.mxu3 %v1910_v17 }
  0xbe   :  { %v522_v4 = vadd.f32 %v521_v2, %v155_v36  ;;  %v535_v5 = vpop.f32.mrf.mxu3  ;;  %1004 = vmatmul.bf16.vlgmr.msra.gmra.mxu0 %v602_v1  ;;  %v2200_v2 = vld [vmem:[%s2516_s6 + $0x8] sm:$0xff] }
  0xbf   :  { %1246 = vmatpush.bf16.msra.mxu0 %v2206_v58  ;;  %v2228_v58 = vld [vmem:[#allocation6 + $0x64] sm:$0xf0] }
  0xc0   :  { %v536_v10 = vadd.f32 %v535_v5, %v522_v4  ;;  %v2199_v4 = vld [vmem:[%s2516_s6] sm:$0xff] }
  0xc1   :  { %1099 = vmatpush.bf16.msrb.mxu3 %v1902_v26  ;;  %v2211_v5 = vld [vmem:[%s2516_s6 + $0x60] sm:$0xff] }
  0xc2   :  { %v599_v14 = vmax.f32 %v536_v10, 0.0  ;;  %v2208_v10 = vld [vmem:[%s2516_s6 + $0x48] sm:$0xff] }
  0xc3   :  { %1247 = vmatpush.bf16.msra.mxu0 %v2205_v59  ;;  %v2227_v59 = vld [vmem:[#allocation6 + $0x64] sm:$0xf] }
  0xc4   :  { %v603_v21 = vpack.c.bf16 %v599_v14, %v595_v9  ;;  %v2207_v14 = vld [vmem:[%s2516_s6 + $0x40] sm:$0xff] }
  0xc5   :  { %1100 = vmatpush.bf16.msrb.mxu3 %v1894_v30 }
  0xc6   :  { %1018 = vmatmul.bf16.vlgmr.msra.gmra.mxu1 %v603_v21 }
  0xc7   :  { %1248 = vmatpush.bf16.msra.mxu0 %v2204_v60  ;;  %1260 = vmatpush.bf16.msra.mxu1 %v2214_v63  ;;  %v2049_v63 = vld [vmem:[#allocation6 + $0x50] sm:$0xf] }
  0xc9   :  { %1101 = vmatpush.bf16.msrb.mxu3 %v1886_v35 }
  0xcb   :  { %1249 = vmatpush.bf16.msra.mxu0 %v2203_v61  ;;  %v2059_v61 = vld [vmem:[#allocation6 + $0x68] sm:$0xf0] }
  0xcd   :  { %v547_v31 = vpop.f32.mrf.mxu0 }
  0xce   :  { %v561_v33 = vpop.f32.mrf.mxu1  ;;  %1060 = vmatmul.bf16.vlgmr.msrb.gmra.mxu0 %v602_v1  ;;  %v548_v55 = vadd.f32 %v547_v31, %v156_v32  ;;  %v2213_v1 = vld [vmem:[%s2516_s6 + $0x70] sm:$0xff] }
  0xcf   :  { %1250 = vmatpush.bf16.msra.mxu0 %v2202_v62  ;;  %1261 = vmatpush.bf16.msra.mxu1 %v2213_v1  ;;  %v2062_v62 = vor.u32 %v2227_v59, %v2059_v61  ;;  %v2225_v1 = vld [vmem:[#allocation6 + $0x54] sm:$0xf] }
  0xd0   :  { %v562_v40 = vadd.f32 %v561_v33, %v548_v55  ;;  %v673_v33 = vperm.slane %v670_v11, 1  ;;  %v2033_v11 = vld [vmem:[#allocation6 + $0x30] sm:$0xf] }
  0xd2   :  { %v596_v45 = vmax.f32 %v562_v40, 0.0 }
  0xd3   :  { %1251 = vmatpush.bf16.msra.mxu0 %v2201_v0  ;;  %1262 = vmatpush.bf16.msra.mxu1 %v2212_v3  ;;  %v2226_v0 = vld [vmem:[#allocation6 + $0x54] sm:$0xf0]  ;;  %v2051_v3 = vld [vmem:[#allocation6 + $0x58] sm:$0xf0] }
  0xd5   :  { %v575_v36 = vpop.f32.mrf.mxu2  ;;  %v549_v39 = vpop.f32.mrf.mxu0 }
  0xd6   :  { %v589_v38 = vpop.f32.mrf.mxu3  ;;  %v550_v41 = vadd.f32 %v549_v39, %v156_v32  ;;  %v563_v42 = vpop.f32.mrf.mxu1  ;;  %1074 = vmatmul.bf16.vlgmr.msrb.gmra.mxu1 %v603_v21  ;;  %v576_v44 = vadd.f32 %v575_v36, %v157_v37 }
  0xd7   :  { %1252 = vmatpush.bf16.msra.mxu0 %v2200_v2  ;;  %1263 = vmatpush.bf16.msra.mxu1 %v2211_v5  ;;  %v2050_v2 = vor.u32 %v2226_v0, %v2049_v63  ;;  %v2041_v5 = vld [vmem:[#allocation6 + $0x40] sm:$0xf]  ;;  %v1412_v0 = vld [vmem:[%s2511_s1 + $0x8] sm:$0xff] }
  0xd8   :  { %v564_v43 = vadd.f32 %v563_v42, %v550_v41  ;;  %v590_v50 = vadd.f32 %v589_v38, %v576_v44 }
  0xda   :  { %v600_v46 = vmax.f32 %v564_v43, 0.0  ;;  %v597_v56 = vmax.f32 %v590_v50, 0.0  ;;  %v2065_v50 = vld [vmem:[#allocation6 + $0x70] sm:$0xf] }
  0xdb   :  { %1253 = vmatpush.bf16.msra.mxu0 %v2199_v4  ;;  %1264 = vmatpush.bf16.msra.mxu1 %v2210_v6  ;;  %v2054_v4 = vor.u32 %v2225_v1, %v2051_v3  ;;  %v2224_v6 = vld [vmem:[#allocation6 + $0x44] sm:$0xf0] }
  0xdc   :  { %v604_v47 = vpack.c.bf16 %v600_v46, %v596_v45 }
  0xdd   :  { %v577_v48 = vpop.f32.mrf.mxu2 }
  0xde   :  { %v578_v52 = vadd.f32 %v577_v48, %v157_v37  ;;  %v591_v53 = vpop.f32.mrf.mxu3  ;;  %1032 = vmatmul.bf16.vlgmr.msra.gmra.mxu2 %v604_v47 }
  0xdf   :  { %1265 = vmatpush.bf16.msra.mxu1 %v2209_v8  ;;  %v2042_v8 = vor.u32 %v2224_v6, %v2041_v5 }
  0xe0   :  { %v592_v54 = vadd.f32 %v591_v53, %v578_v52  ;;  %v2230_v52 = vld [vmem:[#allocation6 + $0x74] sm:$0xf0]  ;;  %v2229_v53 = vld [vmem:[#allocation6 + $0x74] sm:$0xf] }
  0xe2   :  { %v601_v57 = vmax.f32 %v592_v54, 0.0  ;;  %v2066_v54 = vor.u32 %v2230_v52, %v2065_v50 }
  0xe3   :  { %1266 = vmatpush.bf16.msra.mxu1 %v2208_v10 }
  0xe4   :  { %v605_v49 = vpack.c.bf16 %v601_v57, %v597_v56  ;;  %v2067_v56 = vld [vmem:[#allocation6 + $0x78] sm:$0xf0]  ;;  %1379 = vmatpush.bf16.msra.mxu2 %v2066_v54 }
  0xe5   :  { %v2070_v57 = vor.u32 %v2229_v53, %v2067_v56 }
  0xe6   :  { %1046 = vmatmul.bf16.vlgmr.msra.gmra.mxu3 %v605_v49 }
  0xe7   :  { %1267 = vmatpush.bf16.msra.mxu1 %v2207_v14  ;;  %1393 = vmatpush.bf16.msra.mxu3 %v2070_v57 }
  0xeb   :  { %1394 = vmatpush.bf16.msra.mxu3 %v2062_v62 }
  0xee   :  { %1088 = vmatmul.bf16.vlgmr.msrb.gmra.mxu2 %v604_v47 }
  0xef   :  { %1395 = vmatpush.bf16.msra.mxu3 %v2054_v4 }
  0xf6   :  { %1102 = vmatmul.bf16.vlgmr.msrb.gmra.mxu3 %v605_v49  ;;  %v2057_v49 = vld [vmem:[#allocation6 + $0x60] sm:$0xf] }
  0xf7   :  { %v2058_v60 = vor.u32 %v2228_v58, %v2057_v49  ;;  %v1411_v49 = vld [vmem:[%s2511_s1] sm:$0xff] }
  0xf9   :  { %1380 = vmatpush.bf16.msra.mxu2 %v2058_v60 }
  0xfd   :  { %1381 = vmatpush.bf16.msra.mxu2 %v2050_v2 }
 0x101   :  { %1382 = vmatpush.bf16.msra.mxu2 %v2042_v8 }
 0x13b   :  { %v1005_v7 = vpop.f32.mrf.mxu0 }
 0x13c   :  { %v1006_v17 = vadd.f32 %v1005_v7, %v672_v13  ;;  %v2223_v7 = vld [vmem:[#allocation6 + $0x44] sm:$0xf] }
 0x143   :  { %v1019_v9 = vpop.f32.mrf.mxu1  ;;  %v1007_v15 = vpop.f32.mrf.mxu0 }
 0x144   :  { %v1020_v20 = vadd.f32 %v1019_v9, %v1006_v17  ;;  %v1008_v21 = vadd.f32 %v1007_v15, %v672_v13  ;;  %v2043_v9 = vld [vmem:[#allocation6 + $0x48] sm:$0xf0]  ;;  %v2221_v13 = vld [vmem:[#allocation6 + $0x34] sm:$0xf]  ;;  %v2035_v15 = vld [vmem:[#allocation6 + $0x38] sm:$0xf0] }
 0x145   :  { %v2046_v10 = vor.u32 %v2223_v7, %v2043_v9  ;;  %v2025_v17 = vld [vmem:[#allocation6 + $0x20] sm:$0xf] }
 0x147   :  { %1396 = vmatpush.bf16.msra.mxu3 %v2046_v10 }
 0x14b   :  { %v1021_v16 = vpop.f32.mrf.mxu1  ;;  %v1061_v24 = vpop.f32.mrf.mxu0 }
 0x14c   :  { %v1022_v22 = vadd.f32 %v1021_v16, %v1008_v21  ;;  %v1062_v55 = vadd.f32 %v1061_v24, %v673_v33  ;;  %v2038_v16 = vor.u32 %v2221_v13, %v2035_v15  ;;  %v2027_v21 = vld [vmem:[#allocation6 + $0x28] sm:$0xf0]  ;;  %v2218_v24 = vld [vmem:[#allocation6 + $0x14] sm:$0xf0] }
 0x14e   :  { %1397 = vmatpush.bf16.msra.mxu3 %v2038_v16 }
 0x153   :  { %v1075_v27 = vpop.f32.mrf.mxu1  ;;  %v1063_v51 = vpop.f32.mrf.mxu0 }
 0x154   :  { %v1076_v37 = vadd.f32 %v1075_v27, %v1062_v55  ;;  %v1064_v38 = vadd.f32 %v1063_v51, %v673_v33  ;;  %v2019_v27 = vld [vmem:[#allocation6 + $0x18] sm:$0xf0]  ;;  %v2011_v33 = vld [vmem:[#allocation6 + $0x8] sm:$0xf0]  ;;  %v2238_v55 = vld [vmem:[%s2517_s7] ss:$0 sm:$0xff] }
 0x15b   :  { %v1077_v36 = vpop.f32.mrf.mxu1 }
 0x15c   :  { %v1078_v40 = vadd.f32 %v1077_v36, %v1064_v38 }
 0x161   :  { %v1033_v12 = vpop.f32.mrf.mxu2 }
 0x162   :  { %v1034_v23 = vadd.f32 %v1033_v12, %v1020_v20  ;;  %v2222_v12 = vld [vmem:[#allocation6 + $0x34] sm:$0xf0] }
 0x163   :  { %v2034_v14 = vor.u32 %v2222_v12, %v2033_v11 }
 0x165   :  { %1383 = vmatpush.bf16.msra.mxu2 %v2034_v14 }
 0x169   :  { %v1047_v18 = vpop.f32.mrf.mxu3  ;;  %v1035_v19 = vpop.f32.mrf.mxu2 }
 0x16a   :  { %v1048_v25 = vadd.f32 %v1047_v18, %v1034_v23  ;;  %v1036_v26 = vadd.f32 %v1035_v19, %v1022_v22  ;;  %v2220_v18 = vld [vmem:[#allocation6 + $0x24] sm:$0xf0]  ;;  %v2219_v19 = vld [vmem:[#allocation6 + $0x24] sm:$0xf]  ;;  %v2017_v23 = vld [vmem:[#allocation6 + $0x10] sm:$0xf] }
 0x16b   :  { %v2026_v20 = vor.u32 %v2220_v18, %v2025_v17  ;;  %v2030_v22 = vor.u32 %v2219_v19, %v2027_v21 }
 0x16c   :  { %v1108_v31 = vmax.f32 %v1048_v25, 0.0  ;;  %v2217_v25 = vld [vmem:[#allocation6 + $0x14] sm:$0xf] }
 0x16d   :  { %1384 = vmatpush.bf16.msra.mxu2 %v2026_v20  ;;  %1398 = vmatpush.bf16.msra.mxu3 %v2030_v22 }
 0x171   :  { %v1049_v28 = vpop.f32.mrf.mxu3  ;;  %v1089_v30 = vpop.f32.mrf.mxu2 }
 0x172   :  { %v1050_v29 = vadd.f32 %v1049_v28, %v1036_v26  ;;  %v1090_v41 = vadd.f32 %v1089_v30, %v1076_v37  ;;  %v2018_v26 = vor.u32 %v2218_v24, %v2017_v23  ;;  %v2022_v28 = vor.u32 %v2217_v25, %v2019_v27  ;;  %v2216_v30 = vld [vmem:[#allocation6 + $0x4] sm:$0xf0] }
 0x174   :  { %v1110_v32 = vmax.f32 %v1050_v29, 0.0  ;;  %1385 = vmatpush.bf16.msra.mxu2 %v2018_v26  ;;  %1399 = vmatpush.bf16.msra.mxu3 %v2022_v28  ;;  %v2009_v29 = vld [vmem:[#allocation6] sm:$0xf] }
 0x176   :  { %v1112_v34 = vpack.c.bf16 %v1110_v32, %v1108_v31  ;;  %v2215_v31 = vld [vmem:[#allocation6 + $0x4] sm:$0xf]  ;;  %v2010_v32 = vor.u32 %v2216_v30, %v2009_v29 }
 0x178   :  { %1254 = vmatmul.bf16.vlgmr.msra.gmra.mxu0 %v1112_v34  ;;  %v2014_v34 = vor.u32 %v2215_v31, %v2011_v33  ;;  %1386 = vmatpush.bf16.msra.mxu2 %v2010_v32 }
 0x179   :  { %v1103_v35 = vpop.f32.mrf.mxu3  ;;  %v1091_v39 = vpop.f32.mrf.mxu2 }
 0x17a   :  { %v1104_v42 = vadd.f32 %v1103_v35, %v1090_v41  ;;  %v1092_v43 = vadd.f32 %v1091_v39, %v1078_v40  ;;  %1400 = vmatpush.bf16.msra.mxu3 %v2014_v34 }
 0x17c   :  { %v1109_v46 = vmax.f32 %v1104_v42, 0.0 }
 0x181   :  { %v1105_v44 = vpop.f32.mrf.mxu3 }
 0x182   :  { %v1106_v45 = vadd.f32 %v1105_v44, %v1092_v43 }
 0x184   :  { %v1111_v47 = vmax.f32 %v1106_v45, 0.0  ;;  %v1293_v45 = vld [vmem:[%s2519_s9] sm:$0x3] }
 0x186   :  { %v1113_v48 = vpack.c.bf16 %v1111_v47, %v1109_v46  ;;  %v1295_v46 = vperm.slane %v1293_v45, 0  ;;  %v1296_v47 = vperm.slane %v1293_v45, 1 }
 0x188   :  { %1268 = vmatmul.bf16.vlgmr.msra.gmra.mxu1 %v1113_v48 }
 0x1f5   :  { %v1255_v51 = vpop.f32.mrf.mxu0 }
 0x1f6   :  { %v1256_v37 = vadd.f32 %v2238_v55, %v1255_v51 }
 0x1fd   :  { %v1257_v36 = vpop.f32.mrf.mxu0 }
 0x1fe   :  { %v1258_v38 = vadd.f32 %v2238_v55, %v1257_v36 }
 0x205   :  { %v1269_v35 = vpop.f32.mrf.mxu1 }
 0x206   :  { %v1270_v39 = vadd.f32 %v1269_v35, %v1256_v37 }
 0x208   :  { %v1274_v42 = vmax.f32 %v1270_v39, 0.0 }
 0x20d   :  { %v1271_v40 = vpop.f32.mrf.mxu1 }
 0x20e   :  { %v1272_v41 = vadd.f32 %v1271_v40, %v1258_v38 }
 0x210   :  { %v1275_v43 = vmax.f32 %v1272_v41, 0.0 }
 0x212   :  { %v1276_v44 = vpack.c.bf16 %v1275_v43, %v1274_v42 }
 0x214   :  { %1387 = vmatmul.bf16.vlgmr.msra.gmra.mxu2 %v1276_v44  ;;  %1401 = vmatmul.bf16.vlgmr.msra.gmra.mxu3 %v1276_v44 }
 0x297   :  { %v1388_v48 = vpop.f32.mrf.mxu2  ;;  %v1402_v50 = vpop.f32.mrf.mxu3 }
 0x298   :  { %v1389_v52 = vadd.f32 %v1388_v48, %v1295_v46  ;;  %v1403_v53 = vadd.f32 %v1402_v50, %v1296_v47 }
 0x29a   :  { %1419 = vst [vmem:[%s2520_s10 + $0x8] sm:$0xff] %v1389_v52  ;;  %v1407_v54 = vmul.f32 1.442695, %v1403_v53 }
 0x29b   :  { %1423 = vst [vmem:[%s2520_s10 + $0x18] sm:$0xff] %v1403_v53 }
 0x29c   :  { %2239 = vpow2.f32 %v1407_v54 }
 0x29f   :  { %v1390_v56 = vpop.f32.mrf.mxu2  ;;  %v1404_v57 = vpop.f32.mrf.mxu3 }
 0x2a0   :  { %v1391_v58 = vadd.f32 %v1390_v56, %v1295_v46  ;;  %v1405_v59 = vadd.f32 %v1404_v57, %v1296_v47 }
 0x2a2   :  { %v2240_v60 = vpop.eup %2239  ;;  %1420 = vst [vmem:[%s2520_s10 + $0x28] sm:$0xff] %v1391_v58  ;;  %v1409_v61 = vmul.f32 1.442695, %v1405_v59 }
 0x2a3   :  { %v1413_v62 = vmul.f32 %v2240_v60, %v1411_v49  ;;  %1421 = vst [vmem:[%s2520_s10 + $0x10] sm:$0xff] %v2240_v60 }
 0x2a4   :  { %2241 = vpow2.f32 %v1409_v61  ;;  %1424 = vst [vmem:[%s2520_s10 + $0x38] sm:$0xff] %v1405_v59 }
 0x2a5   :  { %v1415_v63 = vadd.f32 %v1413_v62, %v1389_v52 }
 0x2a7   :  { %1417 = vst [vmem:[%s2520_s10] sm:$0xff] %v1415_v63 }
 0x2aa   :  { %v2242_v1 = vpop.eup %2241 }
 0x2ab   :  { %v1414_v2 = vmul.f32 %v2242_v1, %v1412_v0  ;;  %1422 = vst [vmem:[%s2520_s10 + $0x30] sm:$0xff] %v2242_v1 }
 0x2ad   :  { %v1416_v3 = vadd.f32 %v1414_v2, %v1391_v58 }
 0x2af   :  { %1418 = vst [vmem:[%s2520_s10 + $0x20] sm:$0xff] %v1416_v3 }
 0x2b0   :  { %1429 = vsyncpa [#allocation3], 1 }
 0x2b1   :  { %1430 = vsyncpa [#allocation5], 1 }

</bundles_post_ra>
